<compile_context>
chip_gen: v7x
topology: tpu7x:2x2x1
jax: 0.10.0
libtpu: 0.0.40
codegen_flags: <defaults>
</compile_context>

<pallas_src>
import functools
import jax
import jax.numpy as jnp
from jax.experimental import pallas as pl
from jax.experimental.pallas import tpu as pltpu

THRESHOLD = 1.0
REFRACTORY_PERIOD = 5.0


def _round_up(x, m):
    return ((x + m - 1) // m) * m


def _ceil_div(a, b):
    return -(-a // b)


def _rsnn_kernel(x_ref, w1_ref, wrec_ref, beta_ref, bias_ref, mem0_ref,
                 spk_out_ref, mem_s, spk_s, refr_s):
    # grid = (batch_tiles, time_chunks); time is the inner (sequential) axis.
    c = pl.program_id(1)

    tc, bt, _ = x_ref.shape           # static chunk length / batch tile / padded N_in
    hp = wrec_ref.shape[1]

    # Start of each batch tile's time sweep: replicate RLIF1's lazy init
    # (spk = 0, mem = randn, refractory = 0).
    @pl.when(c == 0)
    def _():
        mem_s[...] = mem0_ref[...]
        spk_s[...] = jnp.zeros_like(spk_s)
        refr_s[...] = jnp.zeros_like(refr_s)

    # Loop-invariant loads / broadcasts hoisted out of the unrolled time loop
    # (JAX does not CSE broadcast_in_dim, so do these once per chunk).
    w1 = w1_ref[...]                                      # (Nip, Hp) bf16, resident
    wrec = wrec_ref[...]                                  # (Hp,  Hp) bf16, resident
    beta = jnp.broadcast_to(beta_ref[...], (bt, hp))      # clipped beta
    bias = jnp.broadcast_to(bias_ref[...], (bt, hp))      # 70 * (beta - 1)

    # State is carried in vregs across the chunk; scratch is touched once per chunk.
    def step(i, carry):
        spk, mem, refr = carry                            # bf16 / f32 / f32
        # In-kernel input projection (not on the serial spk@Wrec dependence chain).
        cur = jnp.dot(x_ref[i], w1, preferred_element_type=jnp.float32)
        refr = jnp.maximum(refr - 1.0, 0.0)
        # Recurrent contribution: bf16 operands, f32 accumulation (MXU).
        rec = jnp.dot(spk, wrec, preferred_element_type=jnp.float32)
        # base = beta*(mem+70) + cur + rec - 70 == beta*mem + cur + rec + 70*(beta-1)
        base = beta * mem + cur + rec + bias
        # reset_mechanism='zero': mem zeroed where the *old* mem exceeded threshold.
        mem_new = jnp.where(mem > THRESHOLD, 0.0, base)
        spk_bool = (mem_new > THRESHOLD) & (refr <= 0.0)
        refr_new = jnp.where(spk_bool, REFRACTORY_PERIOD, refr)
        spk_new = spk_bool.astype(jnp.bfloat16)           # spikes are exactly {0,1}
        spk_out_ref[i] = spk_new
        return (spk_new, mem_new, refr_new)

    init = (spk_s[...], mem_s[...], refr_s[...])
    spk, mem, refr = jax.lax.fori_loop(0, tc, step, init, unroll=True)

    # Write state back once per chunk (consumed by the next time chunk).
    mem_s[...] = mem
    spk_s[...] = spk
    refr_s[...] = refr


@functools.partial(jax.jit, static_argnames=("tc", "bt"))
def rsnn2_forward(inputs, w1, wrec, beta, mem0, *, tc=32, bt=256):
    """inputs: [T, B, N_in] f32; returns spk_rec: [T, B, H] f32."""
    T, B, N_in = inputs.shape
    H = w1.shape[1]

    # Loop-invariant scalar work hoisted out of the recurrence.
    beta_c = jnp.clip(beta, 0.0, 1.0)
    bias = 70.0 * (beta_c - 1.0)

    # ---------------- tile sizing ----------------
    Tc = max(1, min(tc, T))                 # time steps per grid iteration (unrolled)
    Tp = _round_up(T, Tc)
    Hp = _round_up(H, 128)                  # lanes
    Nip = _round_up(N_in, 128)
    Bp_a = _round_up(B, 16)                 # 16 sublanes: safe for bf16-packed tiles
    Bt = min(_round_up(bt, 16), Bp_a)
    # Prefer >= 2 batch tiles so the "parallel" axis can shard across TensorCores (v7x).
    if Bp_a // Bt < 2 and Bp_a >= 32:
        Bt = _round_up(_ceil_div(Bp_a, 2), 16)
    num_b = _ceil_div(Bp_a, Bt)
    Bp = num_b * Bt
    num_c = Tp // Tc

    # ---------------- pad to hardware tiles ----------------
    # Padded rows/cols/steps are zero everywhere (x, W1, Wrec, beta, bias, mem0), so
    # padded hidden units / batch rows / timesteps never spike and never feed back.
    x_p = jnp.pad(inputs, ((0, Tp - T), (0, Bp - B), (0, Nip - N_in))).astype(jnp.bfloat16)
    w1_p = jnp.pad(w1, ((0, Nip - N_in), (0, Hp - H))).astype(jnp.bfloat16)
    wrec_p = jnp.pad(wrec, ((0, Hp - H), (0, Hp - H))).astype(jnp.bfloat16)
    beta_p = jnp.pad(beta_c, (0, Hp - H)).reshape(1, Hp)
    bias_p = jnp.pad(bias, (0, Hp - H)).reshape(1, Hp)
    mem0_p = jnp.pad(mem0, ((0, Bp - B), (0, Hp - H)))

    # ---------------- explicit scoped-VMEM budget ----------------
    est = (2 * Tc * Bt * Nip * 2            # x chunk (double-buffered, bf16)
           + 2 * Nip * Hp * 2               # W1 (bf16)
           + 2 * Hp * Hp * 2                # Wrec (bf16)
           + 2 * 2 * 8 * Hp * 4             # beta + bias
           + 2 * Bt * Hp * 4                # mem0
           + 2 * Tc * Bt * Hp * 2           # spike output chunk (bf16)
           + Bt * Hp * (4 + 2 + 4))         # mem/spk/refr state scratch
    vmem_limit = int(min(max(est * 1.5 + (2 << 20), 32 << 20), 64 << 20))

    out = pl.pallas_call(
        _rsnn_kernel,
        out_shape=jax.ShapeDtypeStruct((Tp, Bp, Hp), jnp.bfloat16),
        grid_spec=pltpu.PrefetchScalarGridSpec(
            num_scalar_prefetch=0,
            grid=(num_b, num_c),
            in_specs=[
                pl.BlockSpec((Tc, Bt, Nip), lambda b, c: (c, b, 0)),  # raw inputs
                pl.BlockSpec((Nip, Hp), lambda b, c: (0, 0)),         # W1 (resident)
                pl.BlockSpec((Hp, Hp), lambda b, c: (0, 0)),          # Wrec (resident)
                pl.BlockSpec((1, Hp), lambda b, c: (0, 0)),           # clipped beta
                pl.BlockSpec((1, Hp), lambda b, c: (0, 0)),           # bias = 70*(beta-1)
                pl.BlockSpec((Bt, Hp), lambda b, c: (b, 0)),          # initial random mem
            ],
            out_specs=pl.BlockSpec((Tc, Bt, Hp), lambda b, c: (c, b, 0)),
            scratch_shapes=[
                pltpu.VMEM((Bt, Hp), jnp.float32),    # mem
                pltpu.VMEM((Bt, Hp), jnp.bfloat16),   # spk
                pltpu.VMEM((Bt, Hp), jnp.float32),    # refractory counter
            ],
        ),
        compiler_params=pltpu.CompilerParams(
            # batch tiles are independent (megacore-shardable); time is sequential.
            dimension_semantics=("parallel", "arbitrary"),
            vmem_limit_bytes=vmem_limit,
        ),
    )(x_p, w1_p, wrec_p, beta_p, bias_p, mem0_p)

    return out[:T, :B, :H].astype(jnp.float32)


def rsnn2_reference(inputs, w1, wrec, beta, mem0):
    """Pure-JAX reference of the same recurrence (bf16 weights/inputs, f32 accumulation)."""
    beta = jnp.clip(beta, 0.0, 1.0)[None, :]
    bias = 70.0 * (beta - 1.0)
    x_bf = inputs.astype(jnp.bfloat16)
    w1_bf = w1.astype(jnp.bfloat16)
    wrec_bf = wrec.astype(jnp.bfloat16)

    def step(carry, x_t):
        spk, mem, refr = carry
        cur = jnp.dot(x_t, w1_bf, preferred_element_type=jnp.float32)
        refr = jnp.maximum(refr - 1.0, 0.0)
        rec = jnp.dot(spk, wrec_bf, preferred_element_type=jnp.float32)
        base = beta * mem + cur + rec + bias
        mem_new = jnp.where(mem > THRESHOLD, 0.0, base)
        spk_bool = (mem_new > THRESHOLD) & (refr <= 0.0)
        refr = jnp.where(spk_bool, REFRACTORY_PERIOD, refr)
        spk_new = spk_bool.astype(jnp.bfloat16)
        return (spk_new, mem_new, refr), spk_new.astype(jnp.float32)

    B = inputs.shape[1]
    H = w1.shape[1]
    init = (jnp.zeros((B, H), jnp.bfloat16), mem0, jnp.zeros((B, H), jnp.float32))
    _, spk_rec = jax.lax.scan(step, init, x_bf)
    return spk_rec


def make_params(key, num_inputs, num_hidden):
    """Deterministic synthetic weights matching RSNN2.__init__ shapes/structure."""
    mu, sigma = -0.64, 0.51
    pe_e = 0.16
    k1, k2, k3, k4, k5 = jax.random.split(key, 5)

    # input_hid_mx: sparse lognormal, shape (num_inputs, num_hidden); W1 = input_hid_mx
    mask_in = jax.random.bernoulli(k1, pe_e, (num_inputs, num_hidden)).astype(jnp.float32)
    vals_in = jnp.exp(jax.random.normal(k2, (num_inputs, num_hidden)) * sigma + mu)
    w1 = mask_in * vals_in

    # hidden_mx: rows = presynaptic neurons; excitatory rows positive, inhibitory rows negative*10.
    num_exc = round(0.85 * num_hidden)
    num_inh = num_hidden - num_exc
    num_iPV = round(0.4 * num_inh)
    num_iSst = round(0.3 * num_inh)
    num_iHtr = num_inh - num_iSst - num_iPV
    # TODO(synk): per-block connection probabilities p_nn are approximated with one density here.
    mask_h = jax.random.bernoulli(k3, 0.25, (num_hidden, num_hidden)).astype(jnp.float32)
    vals_h = jnp.exp(jax.random.normal(k4, (num_hidden, num_hidden)) * sigma + mu)
    hidden_mx = mask_h * vals_h
    sign = jnp.concatenate(
        [jnp.ones((num_exc,), jnp.float32), -10.0 * jnp.ones((num_inh,), jnp.float32)]
    )[:, None]
    wrec = hidden_mx * sign          # recurrent(spk) = spk @ wrec

    beta = jnp.concatenate([
        jnp.full((num_exc,), 0.85, jnp.float32),
        jnp.full((num_iPV,), 0.70, jnp.float32),
        jnp.full((num_iSst,), 0.30, jnp.float32),
        jnp.full((num_iHtr,), 0.60, jnp.float32),
    ])
    return w1, wrec, beta, k5


if __name__ == "__main__":
    T, B, N_IN, H = 8, 2, 16, 32

    key = jax.random.PRNGKey(0)
    k_in, k_mem, k_w = jax.random.split(key, 3)

    inputs = jax.random.normal(k_in, (T, B, N_IN), dtype=jnp.float32) * 2.0
    w1, wrec, beta, _ = make_params(k_w, N_IN, H)
    # RLIF1 lazily initializes mem with randn_like(input) on the first step.
    mem0 = jax.random.normal(k_mem, (B, H), dtype=jnp.float32)

    spk_rec = rsnn2_forward(inputs, w1, wrec, beta, mem0, tc=8)
    spk_rec = jax.block_until_ready(spk_rec)

    spk_ref = rsnn2_reference(inputs, w1, wrec, beta, mem0)
    assert spk_rec.shape == (T, B, H)
    assert spk_rec.dtype == jnp.float32
    assert jnp.allclose(spk_rec, spk_ref, atol=1e-3), "mismatch vs reference"

    print("KERNEL_OK")
</pallas_src>

<mosaic_0001>
module attributes {stable_mosaic.version = 11 : i64} {
  func.func @_rsnn_kernel(%arg0: i32, %arg1: i32, %arg2: memref<8x16x128xbf16, #tpu.memory_space<vmem>>, %arg3: memref<128x128xbf16, #tpu.memory_space<vmem>>, %arg4: memref<128x128xbf16, #tpu.memory_space<vmem>>, %arg5: memref<1x128xf32, #tpu.memory_space<vmem>>, %arg6: memref<1x128xf32, #tpu.memory_space<vmem>>, %arg7: memref<16x128xf32, #tpu.memory_space<vmem>>, %arg8: memref<8x16x128xbf16, #tpu.memory_space<vmem>>, %arg9: memref<16x128xf32, #tpu.memory_space<vmem>>, %arg10: memref<16x128xbf16, #tpu.memory_space<vmem>>, %arg11: memref<16x128xf32, #tpu.memory_space<vmem>>) attributes {dimension_semantics = [#tpu.dimension_semantics<parallel>, #tpu.dimension_semantics<arbitrary>], iteration_bounds = array<i64: 1, 1>, scalar_prefetch = 0 : i64, scratch_operands = 3 : i64, tpu.core_type = #tpu.core_type<tc>, window_params = [{transform_indices = @transform_0, window_bounds = array<i64: 8, 16, 128>}, {pipeline_mode = #tpu.pipeline_mode<synchronous>, transform_indices = @transform_1, window_bounds = array<i64: 128, 128>}, {pipeline_mode = #tpu.pipeline_mode<synchronous>, transform_indices = @transform_2, window_bounds = array<i64: 128, 128>}, {pipeline_mode = #tpu.pipeline_mode<synchronous>, transform_indices = @transform_3, window_bounds = array<i64: 1, 128>}, {pipeline_mode = #tpu.pipeline_mode<synchronous>, transform_indices = @transform_4, window_bounds = array<i64: 1, 128>}, {transform_indices = @transform_5, window_bounds = array<i64: 16, 128>}, {transform_indices = @transform_6, window_bounds = array<i64: 8, 16, 128>}]} {
    %c0_i32 = arith.constant 0 : i32
    %0 = arith.cmpi eq, %arg1, %c0_i32 : i32
    %1 = arith.extui %0 : i1 to i32
    %c0_i32_0 = arith.constant 0 : i32
    %2 = arith.cmpi ne, %1, %c0_i32_0 : i32
    scf.if %2 {
      %c0_124 = arith.constant 0 : index
      %c0_125 = arith.constant 0 : index
      %265 = vector.load %arg7[%c0_124, %c0_125] : memref<16x128xf32, #tpu.memory_space<vmem>>, vector<16x128xf32>
      %c0_126 = arith.constant 0 : index
      %c0_127 = arith.constant 0 : index
      %266 = vector.load %arg9[%c0_126, %c0_127] : memref<16x128xf32, #tpu.memory_space<vmem>>, vector<16x128xf32>
      tpu.vector_store %arg9[%c0_126, %c0_127], %265 {strides = array<i32>} : memref<16x128xf32, #tpu.memory_space<vmem>>, vector<16x128xf32>,
      %cst_128 = arith.constant 0.000000e+00 : bf16
      %267 = vector.broadcast %cst_128 : bf16 to vector<16x128xbf16>
      %c0_129 = arith.constant 0 : index
      %c0_130 = arith.constant 0 : index
      %268 = vector.load %arg10[%c0_129, %c0_130] : memref<16x128xbf16, #tpu.memory_space<vmem>>, vector<16x128xbf16>
      tpu.vector_store %arg10[%c0_129, %c0_130], %267 {strides = array<i32>} : memref<16x128xbf16, #tpu.memory_space<vmem>>, vector<16x128xbf16>,
      %cst_131 = arith.constant 0.000000e+00 : f32
      %269 = vector.broadcast %cst_131 : f32 to vector<16x128xf32>
      %c0_132 = arith.constant 0 : index
      %c0_133 = arith.constant 0 : index
      %270 = vector.load %arg11[%c0_132, %c0_133] : memref<16x128xf32, #tpu.memory_space<vmem>>, vector<16x128xf32>
      tpu.vector_store %arg11[%c0_132, %c0_133], %269 {strides = array<i32>} : memref<16x128xf32, #tpu.memory_space<vmem>>, vector<16x128xf32>,
    } else {
    }
    %c0 = arith.constant 0 : index
    %c0_1 = arith.constant 0 : index
    %3 = vector.load %arg3[%c0, %c0_1] : memref<128x128xbf16, #tpu.memory_space<vmem>>, vector<128x128xbf16>
    %c0_2 = arith.constant 0 : index
    %c0_3 = arith.constant 0 : index
    %4 = vector.load %arg4[%c0_2, %c0_3] : memref<128x128xbf16, #tpu.memory_space<vmem>>, vector<128x128xbf16>
    %c0_4 = arith.constant 0 : index
    %c0_5 = arith.constant 0 : index
    %5 = vector.load %arg5[%c0_4, %c0_5] : memref<1x128xf32, #tpu.memory_space<vmem>>, vector<1x128xf32>
    %6 = vector.shape_cast %5 : vector<1x128xf32> to vector<1x128xf32>
    %7 = vector.broadcast %6 : vector<1x128xf32> to vector<16x128xf32>
    %c0_6 = arith.constant 0 : index
    %c0_7 = arith.constant 0 : index
    %8 = vector.load %arg6[%c0_6, %c0_7] : memref<1x128xf32, #tpu.memory_space<vmem>>, vector<1x128xf32>
    %9 = vector.shape_cast %8 : vector<1x128xf32> to vector<1x128xf32>
    %10 = vector.broadcast %9 : vector<1x128xf32> to vector<16x128xf32>
    %c0_8 = arith.constant 0 : index
    %c0_9 = arith.constant 0 : index
    %11 = vector.load %arg10[%c0_8, %c0_9] : memref<16x128xbf16, #tpu.memory_space<vmem>>, vector<16x128xbf16>
    %c0_10 = arith.constant 0 : index
    %c0_11 = arith.constant 0 : index
    %12 = vector.load %arg9[%c0_10, %c0_11] : memref<16x128xf32, #tpu.memory_space<vmem>>, vector<16x128xf32>
    %c0_12 = arith.constant 0 : index
    %c0_13 = arith.constant 0 : index
    %13 = vector.load %arg11[%c0_12, %c0_13] : memref<16x128xf32, #tpu.memory_space<vmem>>, vector<16x128xf32>
    %c0_i32_14 = arith.constant 0 : i32
    %14 = arith.index_cast %c0_i32_14 : i32 to index
    %c0_15 = arith.constant 0 : index
    %c0_16 = arith.constant 0 : index
    %15 = vector.load %arg2[%14, %c0_15, %c0_16] : memref<8x16x128xbf16, #tpu.memory_space<vmem>>, vector<1x16x128xbf16>
    %16 = vector.shape_cast %15 : vector<1x16x128xbf16> to vector<16x128xbf16>
    %cst = arith.constant dense<0.000000e+00> : vector<16x128xf32>
    %17 = tpu.matmul %16, %3, %cst {dimension_numbers = #tpu.dot_dimension_numbers<[1], [0], [0], [1], [0, 0, 1, 1], [], []>} : vector<16x128xbf16>, vector<128x128xbf16>, vector<16x128xf32> -> vector<16x128xf32>
    %cst_17 = arith.constant 1.000000e+00 : f32
    %18 = vector.broadcast %cst_17 : f32 to vector<16x128xf32>
    %19 = arith.subf %13, %18 : vector<16x128xf32>
    %cst_18 = arith.constant 0.000000e+00 : f32
    %20 = vector.broadcast %cst_18 : f32 to vector<16x128xf32>
    %21 = arith.maximumf %19, %20 : vector<16x128xf32>
    %cst_19 = arith.constant dense<0.000000e+00> : vector<16x128xf32>
    %22 = tpu.matmul %11, %4, %cst_19 {dimension_numbers = #tpu.dot_dimension_numbers<[1], [0], [0], [1], [0, 0, 1, 1], [], []>} : vector<16x128xbf16>, vector<128x128xbf16>, vector<16x128xf32> -> vector<16x128xf32>
    %23 = arith.mulf %7, %12 : vector<16x128xf32>
    %24 = arith.addf %23, %17 : vector<16x128xf32>
    %25 = arith.addf %24, %22 : vector<16x128xf32>
    %26 = arith.addf %25, %10 : vector<16x128xf32>
    %cst_20 = arith.constant 1.000000e+00 : f32
    %27 = vector.broadcast %cst_20 : f32 to vector<16x128xf32>
    %28 = arith.cmpf ogt, %12, %27 : vector<16x128xf32>
    %cst_21 = arith.constant 0.000000e+00 : f32
    %29 = vector.broadcast %cst_21 : f32 to vector<16x128xf32>
    %30 = arith.select %28, %29, %26 : vector<16x128xi1>, vector<16x128xf32>
    %cst_22 = arith.constant 1.000000e+00 : f32
    %31 = vector.broadcast %cst_22 : f32 to vector<16x128xf32>
    %32 = arith.cmpf ogt, %30, %31 : vector<16x128xf32>
    %cst_23 = arith.constant 0.000000e+00 : f32
    %33 = vector.broadcast %cst_23 : f32 to vector<16x128xf32>
    %34 = arith.cmpf ole, %21, %33 : vector<16x128xf32>
    %35 = arith.andi %32, %34 : vector<16x128xi1>
    %cst_24 = arith.constant 5.000000e+00 : f32
    %36 = vector.broadcast %cst_24 : f32 to vector<16x128xf32>
    %37 = arith.select %35, %36, %21 : vector<16x128xi1>, vector<16x128xf32>
    %38 = arith.extui %35 : vector<16x128xi1> to vector<16x128xi32>
    %39 = arith.sitofp %38 : vector<16x128xi32> to vector<16x128xf32>
    %40 = arith.truncf %39 : vector<16x128xf32> to vector<16x128xbf16>
    %41 = arith.index_cast %c0_i32_14 : i32 to index
    %c0_25 = arith.constant 0 : index
    %c0_26 = arith.constant 0 : index
    %42 = vector.load %arg8[%41, %c0_25, %c0_26] : memref<8x16x128xbf16, #tpu.memory_space<vmem>>, vector<1x16x128xbf16>
    %43 = vector.shape_cast %42 : vector<1x16x128xbf16> to vector<16x128xbf16>
    %44 = vector.shape_cast %40 : vector<16x128xbf16> to vector<1x16x128xbf16>
    tpu.vector_store %arg8[%41, %c0_25, %c0_26], %44 {strides = array<i32>} : memref<8x16x128xbf16, #tpu.memory_space<vmem>>, vector<1x16x128xbf16>,
    %c1_i32 = arith.constant 1 : i32
    %45 = arith.index_cast %c1_i32 : i32 to index
    %c0_27 = arith.constant 0 : index
    %c0_28 = arith.constant 0 : index
    %46 = vector.load %arg2[%45, %c0_27, %c0_28] : memref<8x16x128xbf16, #tpu.memory_space<vmem>>, vector<1x16x128xbf16>
    %47 = vector.shape_cast %46 : vector<1x16x128xbf16> to vector<16x128xbf16>
    %cst_29 = arith.constant dense<0.000000e+00> : vector<16x128xf32>
    %48 = tpu.matmul %47, %3, %cst_29 {dimension_numbers = #tpu.dot_dimension_numbers<[1], [0], [0], [1], [0, 0, 1, 1], [], []>} : vector<16x128xbf16>, vector<128x128xbf16>, vector<16x128xf32> -> vector<16x128xf32>
    %cst_30 = arith.constant 1.000000e+00 : f32
    %49 = vector.broadcast %cst_30 : f32 to vector<16x128xf32>
    %50 = arith.subf %37, %49 : vector<16x128xf32>
    %cst_31 = arith.constant 0.000000e+00 : f32
    %51 = vector.broadcast %cst_31 : f32 to vector<16x128xf32>
    %52 = arith.maximumf %50, %51 : vector<16x128xf32>
    %cst_32 = arith.constant dense<0.000000e+00> : vector<16x128xf32>
    %53 = tpu.matmul %40, %4, %cst_32 {dimension_numbers = #tpu.dot_dimension_numbers<[1], [0], [0], [1], [0, 0, 1, 1], [], []>} : vector<16x128xbf16>, vector<128x128xbf16>, vector<16x128xf32> -> vector<16x128xf32>
    %54 = arith.mulf %7, %30 : vector<16x128xf32>
    %55 = arith.addf %54, %48 : vector<16x128xf32>
    %56 = arith.addf %55, %53 : vector<16x128xf32>
    %57 = arith.addf %56, %10 : vector<16x128xf32>
    %cst_33 = arith.constant 1.000000e+00 : f32
    %58 = vector.broadcast %cst_33 : f32 to vector<16x128xf32>
    %59 = arith.cmpf ogt, %30, %58 : vector<16x128xf32>
    %cst_34 = arith.constant 0.000000e+00 : f32
    %60 = vector.broadcast %cst_34 : f32 to vector<16x128xf32>
    %61 = arith.select %59, %60, %57 : vector<16x128xi1>, vector<16x128xf32>
    %cst_35 = arith.constant 1.000000e+00 : f32
    %62 = vector.broadcast %cst_35 : f32 to vector<16x128xf32>
    %63 = arith.cmpf ogt, %61, %62 : vector<16x128xf32>
    %cst_36 = arith.constant 0.000000e+00 : f32
    %64 = vector.broadcast %cst_36 : f32 to vector<16x128xf32>
    %65 = arith.cmpf ole, %52, %64 : vector<16x128xf32>
    %66 = arith.andi %63, %65 : vector<16x128xi1>
    %cst_37 = arith.constant 5.000000e+00 : f32
    %67 = vector.broadcast %cst_37 : f32 to vector<16x128xf32>
    %68 = arith.select %66, %67, %52 : vector<16x128xi1>, vector<16x128xf32>
    %69 = arith.extui %66 : vector<16x128xi1> to vector<16x128xi32>
    %70 = arith.sitofp %69 : vector<16x128xi32> to vector<16x128xf32>
    %71 = arith.truncf %70 : vector<16x128xf32> to vector<16x128xbf16>
    %72 = arith.index_cast %c1_i32 : i32 to index
    %c0_38 = arith.constant 0 : index
    %c0_39 = arith.constant 0 : index
    %73 = vector.load %arg8[%72, %c0_38, %c0_39] : memref<8x16x128xbf16, #tpu.memory_space<vmem>>, vector<1x16x128xbf16>
    %74 = vector.shape_cast %73 : vector<1x16x128xbf16> to vector<16x128xbf16>
    %75 = vector.shape_cast %71 : vector<16x128xbf16> to vector<1x16x128xbf16>
    tpu.vector_store %arg8[%72, %c0_38, %c0_39], %75 {strides = array<i32>} : memref<8x16x128xbf16, #tpu.memory_space<vmem>>, vector<1x16x128xbf16>,
    %c2_i32 = arith.constant 2 : i32
    %76 = arith.index_cast %c2_i32 : i32 to index
    %c0_40 = arith.constant 0 : index
    %c0_41 = arith.constant 0 : index
    %77 = vector.load %arg2[%76, %c0_40, %c0_41] : memref<8x16x128xbf16, #tpu.memory_space<vmem>>, vector<1x16x128xbf16>
    %78 = vector.shape_cast %77 : vector<1x16x128xbf16> to vector<16x128xbf16>
    %cst_42 = arith.constant dense<0.000000e+00> : vector<16x128xf32>
    %79 = tpu.matmul %78, %3, %cst_42 {dimension_numbers = #tpu.dot_dimension_numbers<[1], [0], [0], [1], [0, 0, 1, 1], [], []>} : vector<16x128xbf16>, vector<128x128xbf16>, vector<16x128xf32> -> vector<16x128xf32>
    %cst_43 = arith.constant 1.000000e+00 : f32
    %80 = vector.broadcast %cst_43 : f32 to vector<16x128xf32>
    %81 = arith.subf %68, %80 : vector<16x128xf32>
    %cst_44 = arith.constant 0.000000e+00 : f32
    %82 = vector.broadcast %cst_44 : f32 to vector<16x128xf32>
    %83 = arith.maximumf %81, %82 : vector<16x128xf32>
    %cst_45 = arith.constant dense<0.000000e+00> : vector<16x128xf32>
    %84 = tpu.matmul %71, %4, %cst_45 {dimension_numbers = #tpu.dot_dimension_numbers<[1], [0], [0], [1], [0, 0, 1, 1], [], []>} : vector<16x128xbf16>, vector<128x128xbf16>, vector<16x128xf32> -> vector<16x128xf32>
    %85 = arith.mulf %7, %61 : vector<16x128xf32>
    %86 = arith.addf %85, %79 : vector<16x128xf32>
    %87 = arith.addf %86, %84 : vector<16x128xf32>
    %88 = arith.addf %87, %10 : vector<16x128xf32>
    %cst_46 = arith.constant 1.000000e+00 : f32
    %89 = vector.broadcast %cst_46 : f32 to vector<16x128xf32>
    %90 = arith.cmpf ogt, %61, %89 : vector<16x128xf32>
    %cst_47 = arith.constant 0.000000e+00 : f32
    %91 = vector.broadcast %cst_47 : f32 to vector<16x128xf32>
    %92 = arith.select %90, %91, %88 : vector<16x128xi1>, vector<16x128xf32>
    %cst_48 = arith.constant 1.000000e+00 : f32
    %93 = vector.broadcast %cst_48 : f32 to vector<16x128xf32>
    %94 = arith.cmpf ogt, %92, %93 : vector<16x128xf32>
    %cst_49 = arith.constant 0.000000e+00 : f32
    %95 = vector.broadcast %cst_49 : f32 to vector<16x128xf32>
    %96 = arith.cmpf ole, %83, %95 : vector<16x128xf32>
    %97 = arith.andi %94, %96 : vector<16x128xi1>
    %cst_50 = arith.constant 5.000000e+00 : f32
    %98 = vector.broadcast %cst_50 : f32 to vector<16x128xf32>
    %99 = arith.select %97, %98, %83 : vector<16x128xi1>, vector<16x128xf32>
    %100 = arith.extui %97 : vector<16x128xi1> to vector<16x128xi32>
    %101 = arith.sitofp %100 : vector<16x128xi32> to vector<16x128xf32>
    %102 = arith.truncf %101 : vector<16x128xf32> to vector<16x128xbf16>
    %103 = arith.index_cast %c2_i32 : i32 to index
    %c0_51 = arith.constant 0 : index
    %c0_52 = arith.constant 0 : index
    %104 = vector.load %arg8[%103, %c0_51, %c0_52] : memref<8x16x128xbf16, #tpu.memory_space<vmem>>, vector<1x16x128xbf16>
    %105 = vector.shape_cast %104 : vector<1x16x128xbf16> to vector<16x128xbf16>
    %106 = vector.shape_cast %102 : vector<16x128xbf16> to vector<1x16x128xbf16>
    tpu.vector_store %arg8[%103, %c0_51, %c0_52], %106 {strides = array<i32>} : memref<8x16x128xbf16, #tpu.memory_space<vmem>>, vector<1x16x128xbf16>,
    %c3_i32 = arith.constant 3 : i32
    %107 = arith.index_cast %c3_i32 : i32 to index
    %c0_53 = arith.constant 0 : index
    %c0_54 = arith.constant 0 : index
    %108 = vector.load %arg2[%107, %c0_53, %c0_54] : memref<8x16x128xbf16, #tpu.memory_space<vmem>>, vector<1x16x128xbf16>
    %109 = vector.shape_cast %108 : vector<1x16x128xbf16> to vector<16x128xbf16>
    %cst_55 = arith.constant dense<0.000000e+00> : vector<16x128xf32>
    %110 = tpu.matmul %109, %3, %cst_55 {dimension_numbers = #tpu.dot_dimension_numbers<[1], [0], [0], [1], [0, 0, 1, 1], [], []>} : vector<16x128xbf16>, vector<128x128xbf16>, vector<16x128xf32> -> vector<16x128xf32>
    %cst_56 = arith.constant 1.000000e+00 : f32
    %111 = vector.broadcast %cst_56 : f32 to vector<16x128xf32>
    %112 = arith.subf %99, %111 : vector<16x128xf32>
    %cst_57 = arith.constant 0.000000e+00 : f32
    %113 = vector.broadcast %cst_57 : f32 to vector<16x128xf32>
    %114 = arith.maximumf %112, %113 : vector<16x128xf32>
    %cst_58 = arith.constant dense<0.000000e+00> : vector<16x128xf32>
    %115 = tpu.matmul %102, %4, %cst_58 {dimension_numbers = #tpu.dot_dimension_numbers<[1], [0], [0], [1], [0, 0, 1, 1], [], []>} : vector<16x128xbf16>, vector<128x128xbf16>, vector<16x128xf32> -> vector<16x128xf32>
    %116 = arith.mulf %7, %92 : vector<16x128xf32>
    %117 = arith.addf %116, %110 : vector<16x128xf32>
    %118 = arith.addf %117, %115 : vector<16x128xf32>
    %119 = arith.addf %118, %10 : vector<16x128xf32>
    %cst_59 = arith.constant 1.000000e+00 : f32
    %120 = vector.broadcast %cst_59 : f32 to vector<16x128xf32>
    %121 = arith.cmpf ogt, %92, %120 : vector<16x128xf32>
    %cst_60 = arith.constant 0.000000e+00 : f32
    %122 = vector.broadcast %cst_60 : f32 to vector<16x128xf32>
    %123 = arith.select %121, %122, %119 : vector<16x128xi1>, vector<16x128xf32>
    %cst_61 = arith.constant 1.000000e+00 : f32
    %124 = vector.broadcast %cst_61 : f32 to vector<16x128xf32>
    %125 = arith.cmpf ogt, %123, %124 : vector<16x128xf32>
    %cst_62 = arith.constant 0.000000e+00 : f32
    %126 = vector.broadcast %cst_62 : f32 to vector<16x128xf32>
    %127 = arith.cmpf ole, %114, %126 : vector<16x128xf32>
    %128 = arith.andi %125, %127 : vector<16x128xi1>
    %cst_63 = arith.constant 5.000000e+00 : f32
    %129 = vector.broadcast %cst_63 : f32 to vector<16x128xf32>
    %130 = arith.select %128, %129, %114 : vector<16x128xi1>, vector<16x128xf32>
    %131 = arith.extui %128 : vector<16x128xi1> to vector<16x128xi32>
    %132 = arith.sitofp %131 : vector<16x128xi32> to vector<16x128xf32>
    %133 = arith.truncf %132 : vector<16x128xf32> to vector<16x128xbf16>
    %134 = arith.index_cast %c3_i32 : i32 to index
    %c0_64 = arith.constant 0 : index
    %c0_65 = arith.constant 0 : index
    %135 = vector.load %arg8[%134, %c0_64, %c0_65] : memref<8x16x128xbf16, #tpu.memory_space<vmem>>, vector<1x16x128xbf16>
    %136 = vector.shape_cast %135 : vector<1x16x128xbf16> to vector<16x128xbf16>
    %137 = vector.shape_cast %133 : vector<16x128xbf16> to vector<1x16x128xbf16>
    tpu.vector_store %arg8[%134, %c0_64, %c0_65], %137 {strides = array<i32>} : memref<8x16x128xbf16, #tpu.memory_space<vmem>>, vector<1x16x128xbf16>,
    %c4_i32 = arith.constant 4 : i32
    %138 = arith.index_cast %c4_i32 : i32 to index
    %c0_66 = arith.constant 0 : index
    %c0_67 = arith.constant 0 : index
    %139 = vector.load %arg2[%138, %c0_66, %c0_67] : memref<8x16x128xbf16, #tpu.memory_space<vmem>>, vector<1x16x128xbf16>
    %140 = vector.shape_cast %139 : vector<1x16x128xbf16> to vector<16x128xbf16>
    %cst_68 = arith.constant dense<0.000000e+00> : vector<16x128xf32>
    %141 = tpu.matmul %140, %3, %cst_68 {dimension_numbers = #tpu.dot_dimension_numbers<[1], [0], [0], [1], [0, 0, 1, 1], [], []>} : vector<16x128xbf16>, vector<128x128xbf16>, vector<16x128xf32> -> vector<16x128xf32>
    %cst_69 = arith.constant 1.000000e+00 : f32
    %142 = vector.broadcast %cst_69 : f32 to vector<16x128xf32>
    %143 = arith.subf %130, %142 : vector<16x128xf32>
    %cst_70 = arith.constant 0.000000e+00 : f32
    %144 = vector.broadcast %cst_70 : f32 to vector<16x128xf32>
    %145 = arith.maximumf %143, %144 : vector<16x128xf32>
    %cst_71 = arith.constant dense<0.000000e+00> : vector<16x128xf32>
    %146 = tpu.matmul %133, %4, %cst_71 {dimension_numbers = #tpu.dot_dimension_numbers<[1], [0], [0], [1], [0, 0, 1, 1], [], []>} : vector<16x128xbf16>, vector<128x128xbf16>, vector<16x128xf32> -> vector<16x128xf32>
    %147 = arith.mulf %7, %123 : vector<16x128xf32>
    %148 = arith.addf %147, %141 : vector<16x128xf32>
    %149 = arith.addf %148, %146 : vector<16x128xf32>
    %150 = arith.addf %149, %10 : vector<16x128xf32>
    %cst_72 = arith.constant 1.000000e+00 : f32
    %151 = vector.broadcast %cst_72 : f32 to vector<16x128xf32>
    %152 = arith.cmpf ogt, %123, %151 : vector<16x128xf32>
    %cst_73 = arith.constant 0.000000e+00 : f32
    %153 = vector.broadcast %cst_73 : f32 to vector<16x128xf32>
    %154 = arith.select %152, %153, %150 : vector<16x128xi1>, vector<16x128xf32>
    %cst_74 = arith.constant 1.000000e+00 : f32
    %155 = vector.broadcast %cst_74 : f32 to vector<16x128xf32>
    %156 = arith.cmpf ogt, %154, %155 : vector<16x128xf32>
    %cst_75 = arith.constant 0.000000e+00 : f32
    %157 = vector.broadcast %cst_75 : f32 to vector<16x128xf32>
    %158 = arith.cmpf ole, %145, %157 : vector<16x128xf32>
    %159 = arith.andi %156, %158 : vector<16x128xi1>
    %cst_76 = arith.constant 5.000000e+00 : f32
    %160 = vector.broadcast %cst_76 : f32 to vector<16x128xf32>
    %161 = arith.select %159, %160, %145 : vector<16x128xi1>, vector<16x128xf32>
    %162 = arith.extui %159 : vector<16x128xi1> to vector<16x128xi32>
    %163 = arith.sitofp %162 : vector<16x128xi32> to vector<16x128xf32>
    %164 = arith.truncf %163 : vector<16x128xf32> to vector<16x128xbf16>
    %165 = arith.index_cast %c4_i32 : i32 to index
    %c0_77 = arith.constant 0 : index
    %c0_78 = arith.constant 0 : index
    %166 = vector.load %arg8[%165, %c0_77, %c0_78] : memref<8x16x128xbf16, #tpu.memory_space<vmem>>, vector<1x16x128xbf16>
    %167 = vector.shape_cast %166 : vector<1x16x128xbf16> to vector<16x128xbf16>
    %168 = vector.shape_cast %164 : vector<16x128xbf16> to vector<1x16x128xbf16>
    tpu.vector_store %arg8[%165, %c0_77, %c0_78], %168 {strides = array<i32>} : memref<8x16x128xbf16, #tpu.memory_space<vmem>>, vector<1x16x128xbf16>,
    %c5_i32 = arith.constant 5 : i32
    %169 = arith.index_cast %c5_i32 : i32 to index
    %c0_79 = arith.constant 0 : index
    %c0_80 = arith.constant 0 : index
    %170 = vector.load %arg2[%169, %c0_79, %c0_80] : memref<8x16x128xbf16, #tpu.memory_space<vmem>>, vector<1x16x128xbf16>
    %171 = vector.shape_cast %170 : vector<1x16x128xbf16> to vector<16x128xbf16>
    %cst_81 = arith.constant dense<0.000000e+00> : vector<16x128xf32>
    %172 = tpu.matmul %171, %3, %cst_81 {dimension_numbers = #tpu.dot_dimension_numbers<[1], [0], [0], [1], [0, 0, 1, 1], [], []>} : vector<16x128xbf16>, vector<128x128xbf16>, vector<16x128xf32> -> vector<16x128xf32>
    %cst_82 = arith.constant 1.000000e+00 : f32
    %173 = vector.broadcast %cst_82 : f32 to vector<16x128xf32>
    %174 = arith.subf %161, %173 : vector<16x128xf32>
    %cst_83 = arith.constant 0.000000e+00 : f32
    %175 = vector.broadcast %cst_83 : f32 to vector<16x128xf32>
    %176 = arith.maximumf %174, %175 : vector<16x128xf32>
    %cst_84 = arith.constant dense<0.000000e+00> : vector<16x128xf32>
    %177 = tpu.matmul %164, %4, %cst_84 {dimension_numbers = #tpu.dot_dimension_numbers<[1], [0], [0], [1], [0, 0, 1, 1], [], []>} : vector<16x128xbf16>, vector<128x128xbf16>, vector<16x128xf32> -> vector<16x128xf32>
    %178 = arith.mulf %7, %154 : vector<16x128xf32>
    %179 = arith.addf %178, %172 : vector<16x128xf32>
    %180 = arith.addf %179, %177 : vector<16x128xf32>
    %181 = arith.addf %180, %10 : vector<16x128xf32>
    %cst_85 = arith.constant 1.000000e+00 : f32
    %182 = vector.broadcast %cst_85 : f32 to vector<16x128xf32>
    %183 = arith.cmpf ogt, %154, %182 : vector<16x128xf32>
    %cst_86 = arith.constant 0.000000e+00 : f32
    %184 = vector.broadcast %cst_86 : f32 to vector<16x128xf32>
    %185 = arith.select %183, %184, %181 : vector<16x128xi1>, vector<16x128xf32>
    %cst_87 = arith.constant 1.000000e+00 : f32
    %186 = vector.broadcast %cst_87 : f32 to vector<16x128xf32>
    %187 = arith.cmpf ogt, %185, %186 : vector<16x128xf32>
    %cst_88 = arith.constant 0.000000e+00 : f32
    %188 = vector.broadcast %cst_88 : f32 to vector<16x128xf32>
    %189 = arith.cmpf ole, %176, %188 : vector<16x128xf32>
    %190 = arith.andi %187, %189 : vector<16x128xi1>
    %cst_89 = arith.constant 5.000000e+00 : f32
    %191 = vector.broadcast %cst_89 : f32 to vector<16x128xf32>
    %192 = arith.select %190, %191, %176 : vector<16x128xi1>, vector<16x128xf32>
    %193 = arith.extui %190 : vector<16x128xi1> to vector<16x128xi32>
    %194 = arith.sitofp %193 : vector<16x128xi32> to vector<16x128xf32>
    %195 = arith.truncf %194 : vector<16x128xf32> to vector<16x128xbf16>
    %196 = arith.index_cast %c5_i32 : i32 to index
    %c0_90 = arith.constant 0 : index
    %c0_91 = arith.constant 0 : index
    %197 = vector.load %arg8[%196, %c0_90, %c0_91] : memref<8x16x128xbf16, #tpu.memory_space<vmem>>, vector<1x16x128xbf16>
    %198 = vector.shape_cast %197 : vector<1x16x128xbf16> to vector<16x128xbf16>
    %199 = vector.shape_cast %195 : vector<16x128xbf16> to vector<1x16x128xbf16>
    tpu.vector_store %arg8[%196, %c0_90, %c0_91], %199 {strides = array<i32>} : memref<8x16x128xbf16, #tpu.memory_space<vmem>>, vector<1x16x128xbf16>,
    %c6_i32 = arith.constant 6 : i32
    %200 = arith.index_cast %c6_i32 : i32 to index
    %c0_92 = arith.constant 0 : index
    %c0_93 = arith.constant 0 : index
    %201 = vector.load %arg2[%200, %c0_92, %c0_93] : memref<8x16x128xbf16, #tpu.memory_space<vmem>>, vector<1x16x128xbf16>
    %202 = vector.shape_cast %201 : vector<1x16x128xbf16> to vector<16x128xbf16>
    %cst_94 = arith.constant dense<0.000000e+00> : vector<16x128xf32>
    %203 = tpu.matmul %202, %3, %cst_94 {dimension_numbers = #tpu.dot_dimension_numbers<[1], [0], [0], [1], [0, 0, 1, 1], [], []>} : vector<16x128xbf16>, vector<128x128xbf16>, vector<16x128xf32> -> vector<16x128xf32>
    %cst_95 = arith.constant 1.000000e+00 : f32
    %204 = vector.broadcast %cst_95 : f32 to vector<16x128xf32>
    %205 = arith.subf %192, %204 : vector<16x128xf32>
    %cst_96 = arith.constant 0.000000e+00 : f32
    %206 = vector.broadcast %cst_96 : f32 to vector<16x128xf32>
    %207 = arith.maximumf %205, %206 : vector<16x128xf32>
    %cst_97 = arith.constant dense<0.000000e+00> : vector<16x128xf32>
    %208 = tpu.matmul %195, %4, %cst_97 {dimension_numbers = #tpu.dot_dimension_numbers<[1], [0], [0], [1], [0, 0, 1, 1], [], []>} : vector<16x128xbf16>, vector<128x128xbf16>, vector<16x128xf32> -> vector<16x128xf32>
    %209 = arith.mulf %7, %185 : vector<16x128xf32>
    %210 = arith.addf %209, %203 : vector<16x128xf32>
    %211 = arith.addf %210, %208 : vector<16x128xf32>
    %212 = arith.addf %211, %10 : vector<16x128xf32>
    %cst_98 = arith.constant 1.000000e+00 : f32
    %213 = vector.broadcast %cst_98 : f32 to vector<16x128xf32>
    %214 = arith.cmpf ogt, %185, %213 : vector<16x128xf32>
    %cst_99 = arith.constant 0.000000e+00 : f32
    %215 = vector.broadcast %cst_99 : f32 to vector<16x128xf32>
    %216 = arith.select %214, %215, %212 : vector<16x128xi1>, vector<16x128xf32>
    %cst_100 = arith.constant 1.000000e+00 : f32
    %217 = vector.broadcast %cst_100 : f32 to vector<16x128xf32>
    %218 = arith.cmpf ogt, %216, %217 : vector<16x128xf32>
    %cst_101 = arith.constant 0.000000e+00 : f32
    %219 = vector.broadcast %cst_101 : f32 to vector<16x128xf32>
    %220 = arith.cmpf ole, %207, %219 : vector<16x128xf32>
    %221 = arith.andi %218, %220 : vector<16x128xi1>
    %cst_102 = arith.constant 5.000000e+00 : f32
    %222 = vector.broadcast %cst_102 : f32 to vector<16x128xf32>
    %223 = arith.select %221, %222, %207 : vector<16x128xi1>, vector<16x128xf32>
    %224 = arith.extui %221 : vector<16x128xi1> to vector<16x128xi32>
    %225 = arith.sitofp %224 : vector<16x128xi32> to vector<16x128xf32>
    %226 = arith.truncf %225 : vector<16x128xf32> to vector<16x128xbf16>
    %227 = arith.index_cast %c6_i32 : i32 to index
    %c0_103 = arith.constant 0 : index
    %c0_104 = arith.constant 0 : index
    %228 = vector.load %arg8[%227, %c0_103, %c0_104] : memref<8x16x128xbf16, #tpu.memory_space<vmem>>, vector<1x16x128xbf16>
    %229 = vector.shape_cast %228 : vector<1x16x128xbf16> to vector<16x128xbf16>
    %230 = vector.shape_cast %226 : vector<16x128xbf16> to vector<1x16x128xbf16>
    tpu.vector_store %arg8[%227, %c0_103, %c0_104], %230 {strides = array<i32>} : memref<8x16x128xbf16, #tpu.memory_space<vmem>>, vector<1x16x128xbf16>,
    %c7_i32 = arith.constant 7 : i32
    %231 = arith.index_cast %c7_i32 : i32 to index
    %c0_105 = arith.constant 0 : index
    %c0_106 = arith.constant 0 : index
    %232 = vector.load %arg2[%231, %c0_105, %c0_106] : memref<8x16x128xbf16, #tpu.memory_space<vmem>>, vector<1x16x128xbf16>
    %233 = vector.shape_cast %232 : vector<1x16x128xbf16> to vector<16x128xbf16>
    %cst_107 = arith.constant dense<0.000000e+00> : vector<16x128xf32>
    %234 = tpu.matmul %233, %3, %cst_107 {dimension_numbers = #tpu.dot_dimension_numbers<[1], [0], [0], [1], [0, 0, 1, 1], [], []>} : vector<16x128xbf16>, vector<128x128xbf16>, vector<16x128xf32> -> vector<16x128xf32>
    %cst_108 = arith.constant 1.000000e+00 : f32
    %235 = vector.broadcast %cst_108 : f32 to vector<16x128xf32>
    %236 = arith.subf %223, %235 : vector<16x128xf32>
    %cst_109 = arith.constant 0.000000e+00 : f32
    %237 = vector.broadcast %cst_109 : f32 to vector<16x128xf32>
    %238 = arith.maximumf %236, %237 : vector<16x128xf32>
    %cst_110 = arith.constant dense<0.000000e+00> : vector<16x128xf32>
    %239 = tpu.matmul %226, %4, %cst_110 {dimension_numbers = #tpu.dot_dimension_numbers<[1], [0], [0], [1], [0, 0, 1, 1], [], []>} : vector<16x128xbf16>, vector<128x128xbf16>, vector<16x128xf32> -> vector<16x128xf32>
    %240 = arith.mulf %7, %216 : vector<16x128xf32>
    %241 = arith.addf %240, %234 : vector<16x128xf32>
    %242 = arith.addf %241, %239 : vector<16x128xf32>
    %243 = arith.addf %242, %10 : vector<16x128xf32>
    %cst_111 = arith.constant 1.000000e+00 : f32
    %244 = vector.broadcast %cst_111 : f32 to vector<16x128xf32>
    %245 = arith.cmpf ogt, %216, %244 : vector<16x128xf32>
    %cst_112 = arith.constant 0.000000e+00 : f32
    %246 = vector.broadcast %cst_112 : f32 to vector<16x128xf32>
    %247 = arith.select %245, %246, %243 : vector<16x128xi1>, vector<16x128xf32>
    %cst_113 = arith.constant 1.000000e+00 : f32
    %248 = vector.broadcast %cst_113 : f32 to vector<16x128xf32>
    %249 = arith.cmpf ogt, %247, %248 : vector<16x128xf32>
    %cst_114 = arith.constant 0.000000e+00 : f32
    %250 = vector.broadcast %cst_114 : f32 to vector<16x128xf32>
    %251 = arith.cmpf ole, %238, %250 : vector<16x128xf32>
    %252 = arith.andi %249, %251 : vector<16x128xi1>
    %cst_115 = arith.constant 5.000000e+00 : f32
    %253 = vector.broadcast %cst_115 : f32 to vector<16x128xf32>
    %254 = arith.select %252, %253, %238 : vector<16x128xi1>, vector<16x128xf32>
    %255 = arith.extui %252 : vector<16x128xi1> to vector<16x128xi32>
    %256 = arith.sitofp %255 : vector<16x128xi32> to vector<16x128xf32>
    %257 = arith.truncf %256 : vector<16x128xf32> to vector<16x128xbf16>
    %258 = arith.index_cast %c7_i32 : i32 to index
    %c0_116 = arith.constant 0 : index
    %c0_117 = arith.constant 0 : index
    %259 = vector.load %arg8[%258, %c0_116, %c0_117] : memref<8x16x128xbf16, #tpu.memory_space<vmem>>, vector<1x16x128xbf16>
    %260 = vector.shape_cast %259 : vector<1x16x128xbf16> to vector<16x128xbf16>
    %261 = vector.shape_cast %257 : vector<16x128xbf16> to vector<1x16x128xbf16>
    tpu.vector_store %arg8[%258, %c0_116, %c0_117], %261 {strides = array<i32>} : memref<8x16x128xbf16, #tpu.memory_space<vmem>>, vector<1x16x128xbf16>,
    %c8_i32 = arith.constant 8 : i32
    %c0_118 = arith.constant 0 : index
    %c0_119 = arith.constant 0 : index
    %262 = vector.load %arg9[%c0_118, %c0_119] : memref<16x128xf32, #tpu.memory_space<vmem>>, vector<16x128xf32>
    tpu.vector_store %arg9[%c0_118, %c0_119], %247 {strides = array<i32>} : memref<16x128xf32, #tpu.memory_space<vmem>>, vector<16x128xf32>,
    %c0_120 = arith.constant 0 : index
    %c0_121 = arith.constant 0 : index
    %263 = vector.load %arg10[%c0_120, %c0_121] : memref<16x128xbf16, #tpu.memory_space<vmem>>, vector<16x128xbf16>
    tpu.vector_store %arg10[%c0_120, %c0_121], %257 {strides = array<i32>} : memref<16x128xbf16, #tpu.memory_space<vmem>>, vector<16x128xbf16>,
    %c0_122 = arith.constant 0 : index
    %c0_123 = arith.constant 0 : index
    %264 = vector.load %arg11[%c0_122, %c0_123] : memref<16x128xf32, #tpu.memory_space<vmem>>, vector<16x128xf32>
    tpu.vector_store %arg11[%c0_122, %c0_123], %254 {strides = array<i32>} : memref<16x128xf32, #tpu.memory_space<vmem>>, vector<16x128xf32>,
    return
  }
  func.func @transform_0(%arg0: i32, %arg1: i32) -> (i32, i32, i32) {
    %c0_i32 = arith.constant 0 : i32
    %c0_i32_0 = arith.constant 0 : i32
    return %arg1, %arg0, %c0_i32 : i32, i32, i32
  }
  func.func @transform_1(%arg0: i32, %arg1: i32) -> (i32, i32) {
    %c0_i32 = arith.constant 0 : i32
    %c0_i32_0 = arith.constant 0 : i32
    %c0_i32_1 = arith.constant 0 : i32
    return %c0_i32, %c0_i32_0 : i32, i32
  }
  func.func @transform_2(%arg0: i32, %arg1: i32) -> (i32, i32) {
    %c0_i32 = arith.constant 0 : i32
    %c0_i32_0 = arith.constant 0 : i32
    %c0_i32_1 = arith.constant 0 : i32
    return %c0_i32, %c0_i32_0 : i32, i32
  }
  func.func @transform_3(%arg0: i32, %arg1: i32) -> (i32, i32) {
    %c0_i32 = arith.constant 0 : i32
    %c0_i32_0 = arith.constant 0 : i32
    %c0_i32_1 = arith.constant 0 : i32
    return %c0_i32, %c0_i32_0 : i32, i32
  }
  func.func @transform_4(%arg0: i32, %arg1: i32) -> (i32, i32) {
    %c0_i32 = arith.constant 0 : i32
    %c0_i32_0 = arith.constant 0 : i32
    %c0_i32_1 = arith.constant 0 : i32
    return %c0_i32, %c0_i32_0 : i32, i32
  }
  func.func @transform_5(%arg0: i32, %arg1: i32) -> (i32, i32) {
    %c0_i32 = arith.constant 0 : i32
    %c0_i32_0 = arith.constant 0 : i32
    return %arg0, %c0_i32 : i32, i32
  }
  func.func @transform_6(%arg0: i32, %arg1: i32) -> (i32, i32, i32) {
    %c0_i32 = arith.constant 0 : i32
    %c0_i32_0 = arith.constant 0 : i32
    return %arg1, %arg0, %c0_i32 : i32, i32, i32
  }
}

</mosaic_0001>

<bundles_post_ra>
// kernel: rsnn2_forward.1
= control target key start
LH: loop header
LB: loop body
LE: loop exit
PB: predicated region body
PF: predicated region fallthrough
CT: control target
= control target key end

     0   :  { %v1875_v0 = vmov 0.0   ;;  %vm1876_vm0 = vmmov 0   ;;  %v1877_v18 = vmov 0   ;;  %v1878_v46 = vmov 1.0|1.0   ;;  %s2627_s1 = inlined_call_operand.vmem [shape: bf16[128,128], index: 1, kind: input, shape index: {}]   ;;  %s2628_s2 = inlined_call_operand.vmem [shape: bf16[128,128], index: 2, kind: input, shape index: {}]   ;;  %s2629_s0 = inlined_call_operand.vmem [shape: bf16[8,16,128], index: 0, kind: input, shape index: {}]   ;;  %s2630_s3 = inlined_call_operand.vmem [shape: f32[1,128], index: 3, kind: input, shape index: {}]   ;;  %s2631_s5 = inlined_call_operand.vmem [shape: f32[16,128], index: 5, kind: input, shape index: {}]   ;;  %s2632_s4 = inlined_call_operand.vmem [shape: f32[1,128], index: 4, kind: input, shape index: {}]   ;;  %s2633_s6 = inlined_call_operand.vmem [shape: bf16[8,16,128], index: 6, kind: output, shape index: {}]  }
   0x1   :  { %1522 = vmatprep.subr.bf16.mxu0 %v1875_v0  ;;  %1542 = vmatprep.subr.bf16.mxu1 %v1875_v0  ;;  %v1919_v1 = vld [vmem:[%s2627_s1] sm:$0xff]   ;;  %v1934_v3 = vld [vmem:[%s2627_s1 + $0x8] sm:$0xff]   ;;  %v1948_v5 = vld [vmem:[%s2627_s1 + $0x10] sm:$0xff]  }
   0x2   :  { %v1924_v2 = vld [vmem:[%s2628_s2] sm:$0xff]   ;;  %1538 = vmatprep.mubr.msk.bf16.mxu0 %vm1876_vm0, %v1875_v0  ;;  %1558 = vmatprep.mubr.msk.bf16.mxu1 %vm1876_vm0, %v1875_v0  ;;  %v1941_v4 = vld [vmem:[%s2628_s2 + $0x8] sm:$0xff]   ;;  %v1955_v6 = vld [vmem:[%s2628_s2 + $0x10] sm:$0xff]  }
   0x3   :  { %1523 = vmatpush3.bf16.msra.mxu0 %v1919_v1  ;;  %1543 = vmatpush3.bf16.msra.mxu1 %v1924_v2  ;;  %v1962_v7 = vld [vmem:[%s2627_s1 + $0x18] sm:$0xff]   ;;  %v1976_v9 = vld [vmem:[%s2627_s1 + $0x20] sm:$0xff]   ;;  %v1990_v11 = vld [vmem:[%s2627_s1 + $0x28] sm:$0xff]  }
   0x4   :  { %1524 = vmatprep.subr.bf16.mxu0 %v1875_v0  ;;  %1544 = vmatprep.subr.bf16.mxu1 %v1875_v0  ;;  %v1969_v8 = vld [vmem:[%s2628_s2 + $0x18] sm:$0xff]   ;;  %v1983_v10 = vld [vmem:[%s2628_s2 + $0x20] sm:$0xff]   ;;  %v1995_v12 = vld [vmem:[%s2628_s2 + $0x28] sm:$0xff]  }
   0x5   :  { %v2004_v13 = vld [vmem:[%s2627_s1 + $0x30] sm:$0xff]   ;;  %v2018_v15 = vld [vmem:[%s2627_s1 + $0x38] sm:$0xff]   ;;  %v1862_v17 = vld [vmem:[%s2629_s0] sm:$0xff]  }
   0x6   :  { %v2011_v14 = vld [vmem:[%s2628_s2 + $0x30] sm:$0xff]   ;;  %v2025_v16 = vld [vmem:[%s2628_s2 + $0x38] sm:$0xff]   ;;  %v1863_v19 = vld [vmem:[%s2629_s0 + $0x8] sm:$0xff]  }
   0x7   :  { %1525 = vmatpush3.bf16.msra.mxu0 %v1934_v3  ;;  %1545 = vmatpush3.bf16.msra.mxu1 %v1941_v4  ;;  %v1864_v20 = vld [vmem:[%s2629_s0 + $0x10] sm:$0xff]   ;;  %v28_v21 = vld [vmem:[%s2631_s5] sm:$0xff]  ;;  %v29_v23 = vld [vmem:[%s2631_s5 + $0x8] sm:$0xff] }
   0x8   :  { %1526 = vmatprep.subr.bf16.mxu0 %v1875_v0  ;;  %1546 = vmatprep.subr.bf16.mxu1 %v1875_v0  ;;  %v2119_v22 = vld [vmem:[%s2630_s3] ss:$0 sm:$0xff]  ;;  %vm284_vm1 = vcmp.gt.f32.partialorder %v28_v21, 1.0  ;;  %vm285_vm2 = vcmp.gt.f32.partialorder %v29_v23, 1.0  ;;  %v1865_v59 = vld [vmem:[%s2629_s0 + $0x18] sm:$0xff]  }
   0x9   :  { %v276_v24 = vmul.f32 %v2119_v22, %v28_v21  ;;  %v277_v25 = vmul.f32 %v2119_v22, %v29_v23  ;;  %v2129_v30 = vld [vmem:[%s2632_s4] ss:$0 sm:$0xff] }
   0xb   :  { %1527 = vmatpush3.bf16.msra.mxu0 %v1948_v5  ;;  %1547 = vmatpush3.bf16.msra.mxu1 %v1955_v6 }
   0xc   :  { %1528 = vmatprep.subr.bf16.mxu0 %v1875_v0  ;;  %1548 = vmatprep.subr.bf16.mxu1 %v1875_v0 }
   0xf   :  { %1529 = vmatpush3.bf16.msra.mxu0 %v1962_v7  ;;  %1549 = vmatpush3.bf16.msra.mxu1 %v1969_v8 }
  0x10   :  { %1530 = vmatprep.subr.bf16.mxu0 %v1875_v0  ;;  %1550 = vmatprep.subr.bf16.mxu1 %v1875_v0 }
  0x13   :  { %1531 = vmatpush3.bf16.msra.mxu0 %v1976_v9  ;;  %1551 = vmatpush3.bf16.msra.mxu1 %v1983_v10 }
  0x14   :  { %1532 = vmatprep.subr.bf16.mxu0 %v1875_v0  ;;  %1552 = vmatprep.subr.bf16.mxu1 %v1875_v0 }
  0x17   :  { %1533 = vmatpush3.bf16.msra.mxu0 %v1990_v11  ;;  %1553 = vmatpush3.bf16.msra.mxu1 %v1995_v12 }
  0x18   :  { %1534 = vmatprep.subr.bf16.mxu0 %v1875_v0  ;;  %1554 = vmatprep.subr.bf16.mxu1 %v1875_v0 }
  0x1b   :  { %1535 = vmatpush3.bf16.msra.mxu0 %v2004_v13  ;;  %1555 = vmatpush3.bf16.msra.mxu1 %v2011_v14 }
  0x1c   :  { %1536 = vmatprep.subr.bf16.mxu0 %v1875_v0  ;;  %1556 = vmatprep.subr.bf16.mxu1 %v1875_v0 }
  0x1f   :  { %1537 = vmatpush3.bf16.msra.mxu0 %v2018_v15  ;;  %1557 = vmatpush3.bf16.msra.mxu1 %v2025_v16 }
  0x20   :  { %1562 = vmatprep.subr.bf16.mxu0 %v1875_v0  ;;  %1582 = vmatprep.subr.bf16.mxu1 %v1875_v0 }
  0x22   :  { %1539 = vmatmul.mubr.bf16.vlgmr.msra.gmra.mrb[0].mxu0 %v1862_v17  ;;  %1559 = vmatmul.mubr.bf16.vlgmr.msra.gmra.mrb[0].mxu1 %v1877_v18 }
  0x23   :  { %1563 = vmatpush3.bf16.msra.mxu0 %v1919_v1  ;;  %1578 = vmatprep.mubr.msk.bf16.mxu0 %vm1876_vm0, %v1875_v0 }
  0x24   :  { %1564 = vmatprep.subr.bf16.mxu0 %v1875_v0  ;;  %1583 = vmatpush3.bf16.msra.mxu1 %v1924_v2 }
  0x25   :  { %1598 = vmatprep.mubr.msk.bf16.mxu1 %vm1876_vm0, %v1875_v0  ;;  %1584 = vmatprep.subr.bf16.mxu1 %v1875_v0 }
  0x27   :  { %1565 = vmatpush3.bf16.msra.mxu0 %v1934_v3 }
  0x28   :  { %1566 = vmatprep.subr.bf16.mxu0 %v1875_v0  ;;  %1585 = vmatpush3.bf16.msra.mxu1 %v1941_v4 }
  0x29   :  { %1586 = vmatprep.subr.bf16.mxu1 %v1875_v0 }
  0x2b   :  { %1567 = vmatpush3.bf16.msra.mxu0 %v1948_v5 }
  0x2c   :  { %1568 = vmatprep.subr.bf16.mxu0 %v1875_v0  ;;  %1587 = vmatpush3.bf16.msra.mxu1 %v1955_v6 }
  0x2d   :  { %1588 = vmatprep.subr.bf16.mxu1 %v1875_v0 }
  0x2f   :  { %1569 = vmatpush3.bf16.msra.mxu0 %v1962_v7 }
  0x30   :  { %1570 = vmatprep.subr.bf16.mxu0 %v1875_v0  ;;  %1589 = vmatpush3.bf16.msra.mxu1 %v1969_v8 }
  0x31   :  { %1590 = vmatprep.subr.bf16.mxu1 %v1875_v0 }
  0x33   :  { %1571 = vmatpush3.bf16.msra.mxu0 %v1976_v9 }
  0x34   :  { %1572 = vmatprep.subr.bf16.mxu0 %v1875_v0  ;;  %1591 = vmatpush3.bf16.msra.mxu1 %v1983_v10 }
  0x35   :  { %1592 = vmatprep.subr.bf16.mxu1 %v1875_v0 }
  0x37   :  { %1573 = vmatpush3.bf16.msra.mxu0 %v1990_v11 }
  0x38   :  { %1574 = vmatprep.subr.bf16.mxu0 %v1875_v0  ;;  %1593 = vmatpush3.bf16.msra.mxu1 %v1995_v12 }
  0x39   :  { %1594 = vmatprep.subr.bf16.mxu1 %v1875_v0 }
  0x3b   :  { %1575 = vmatpush3.bf16.msra.mxu0 %v2004_v13 }
  0x3c   :  { %1576 = vmatprep.subr.bf16.mxu0 %v1875_v0  ;;  %1595 = vmatpush3.bf16.msra.mxu1 %v2011_v14 }
  0x3d   :  { %1596 = vmatprep.subr.bf16.mxu1 %v1875_v0 }
  0x3f   :  { %1577 = vmatpush3.bf16.msra.mxu0 %v2018_v15 }
  0x40   :  { %1602 = vmatprep.subr.bf16.mxu0 %v1875_v0  ;;  %1597 = vmatpush3.bf16.msra.mxu1 %v2025_v16 }
  0x41   :  { %1622 = vmatprep.subr.bf16.mxu1 %v1875_v0 }
  0x42   :  { %1579 = vmatmul.mubr.bf16.vlgmr.msra.gmra.mrb[4].mxu0 %v1863_v19 }
  0x43   :  { %1603 = vmatpush3.bf16.msra.mxu0 %v1919_v1  ;;  %1618 = vmatprep.mubr.msk.bf16.mxu0 %vm1876_vm0, %v1875_v0 }
  0x44   :  { %1604 = vmatprep.subr.bf16.mxu0 %v1875_v0 }
  0x47   :  { %1605 = vmatpush3.bf16.msra.mxu0 %v1934_v3 }
  0x48   :  { %1606 = vmatprep.subr.bf16.mxu0 %v1875_v0 }
  0x4b   :  { %1607 = vmatpush3.bf16.msra.mxu0 %v1948_v5 }
  0x4c   :  { %1608 = vmatprep.subr.bf16.mxu0 %v1875_v0 }
  0x4f   :  { %1609 = vmatpush3.bf16.msra.mxu0 %v1962_v7 }
  0x50   :  { %1610 = vmatprep.subr.bf16.mxu0 %v1875_v0 }
  0x53   :  { %1611 = vmatpush3.bf16.msra.mxu0 %v1976_v9 }
  0x54   :  { %1612 = vmatprep.subr.bf16.mxu0 %v1875_v0 }
  0x57   :  { %1613 = vmatpush3.bf16.msra.mxu0 %v1990_v11 }
  0x58   :  { %1614 = vmatprep.subr.bf16.mxu0 %v1875_v0 }
  0x5b   :  { %1615 = vmatpush3.bf16.msra.mxu0 %v2004_v13 }
  0x5c   :  { %1616 = vmatprep.subr.bf16.mxu0 %v1875_v0 }
  0x5f   :  { %1617 = vmatpush3.bf16.msra.mxu0 %v2018_v15 }
  0x60   :  { %1642 = vmatprep.subr.bf16.mxu0 %v1875_v0 }
  0x62   :  { %1619 = vmatmul.mubr.bf16.vlgmr.msra.gmra.mrb[8].mxu0 %v1864_v20 }
  0x63   :  { %1643 = vmatpush3.bf16.msra.mxu0 %v1919_v1  ;;  %1658 = vmatprep.mubr.msk.bf16.mxu0 %vm1876_vm0, %v1875_v0 }
  0x64   :  { %1644 = vmatprep.subr.bf16.mxu0 %v1875_v0 }
  0x67   :  { %1645 = vmatpush3.bf16.msra.mxu0 %v1934_v3 }
  0x68   :  { %1646 = vmatprep.subr.bf16.mxu0 %v1875_v0 }
  0x6b   :  { %1647 = vmatpush3.bf16.msra.mxu0 %v1948_v5 }
  0x6c   :  { %1648 = vmatprep.subr.bf16.mxu0 %v1875_v0 }
  0x6f   :  { %1649 = vmatpush3.bf16.msra.mxu0 %v1962_v7 }
  0x70   :  { %1650 = vmatprep.subr.bf16.mxu0 %v1875_v0 }
  0x73   :  { %1651 = vmatpush3.bf16.msra.mxu0 %v1976_v9 }
  0x74   :  { %1652 = vmatprep.subr.bf16.mxu0 %v1875_v0 }
  0x77   :  { %1653 = vmatpush3.bf16.msra.mxu0 %v1990_v11 }
  0x78   :  { %1654 = vmatprep.subr.bf16.mxu0 %v1875_v0 }
  0x7b   :  { %1655 = vmatpush3.bf16.msra.mxu0 %v2004_v13 }
  0x7c   :  { %1656 = vmatprep.subr.bf16.mxu0 %v1875_v0 }
  0x7f   :  { %1657 = vmatpush3.bf16.msra.mxu0 %v2018_v15 }
  0x80   :  { %1682 = vmatprep.subr.bf16.mxu0 %v1875_v0 }
  0x82   :  { %1659 = vmatmul.mubr.bf16.vlgmr.msra.gmra.mrb[12].mxu0 %v1865_v59 }
  0x83   :  { %1683 = vmatpush3.bf16.msra.mxu0 %v1919_v1  ;;  %1698 = vmatprep.mubr.msk.bf16.mxu0 %vm1876_vm0, %v1875_v0 }
  0x84   :  { %1684 = vmatprep.subr.bf16.mxu0 %v1875_v0 }
  0x87   :  { %1685 = vmatpush3.bf16.msra.mxu0 %v1934_v3 }
  0x88   :  { %1686 = vmatprep.subr.bf16.mxu0 %v1875_v0 }
  0x8b   :  { %1687 = vmatpush3.bf16.msra.mxu0 %v1948_v5 }
  0x8c   :  { %1688 = vmatprep.subr.bf16.mxu0 %v1875_v0 }
  0x8f   :  { %1689 = vmatpush3.bf16.msra.mxu0 %v1962_v7 }
  0x90   :  { %1690 = vmatprep.subr.bf16.mxu0 %v1875_v0 }
  0x93   :  { %1691 = vmatpush3.bf16.msra.mxu0 %v1976_v9 }
  0x94   :  { %1692 = vmatprep.subr.bf16.mxu0 %v1875_v0 }
  0x97   :  { %1693 = vmatpush3.bf16.msra.mxu0 %v1990_v11 }
  0x98   :  { %1694 = vmatprep.subr.bf16.mxu0 %v1875_v0 }
  0x9b   :  { %1695 = vmatpush3.bf16.msra.mxu0 %v2004_v13 }
  0x9c   :  { %1696 = vmatprep.subr.bf16.mxu0 %v1875_v0 }
  0x9f   :  { %1697 = vmatpush3.bf16.msra.mxu0 %v2018_v15 }
  0xa0   :  { %1722 = vmatprep.subr.bf16.mxu0 %v1875_v0 }
  0xf5   :  { %v176_v26 = vpop.f32.mrb[0].mxu0  ;;  %v269_v28 = vpop.f32.mrb[0].mxu1 }
  0xf6   :  { %v278_v27 = vadd.f32 %v276_v24, %v176_v26  ;;  %v1540_v29 = vpop.f32.mrb[1].mxu0  ;;  %v1560_v31 = vpop.f32.mrb[1].mxu1 }
  0xf7   :  { %v179_v32 = vpop.f32.mrb[2].mxu0  ;;  %v272_v35 = vpop.f32.mrb[2].mxu1 }
  0xf8   :  { %v280_v33 = vadd.f32 %v278_v27, %v269_v28  ;;  %v279_v34 = vadd.f32 %v277_v25, %v179_v32  ;;  %v1541_v36 = vpop.f32.mrb[3].mxu0  ;;  %v1561_v37 = vpop.f32.mrb[3].mxu1 }
  0xfa   :  { %v282_v38 = vadd.f32 %v2129_v30, %v280_v33  ;;  %v281_v39 = vadd.f32 %v279_v34, %v272_v35 }
  0xfc   :  { %v2132_v40 = vsel %vm284_vm1, 0.0, %v282_v38  ;;  %v283_v41 = vadd.f32 %v2129_v30, %v281_v39 }
  0xfd   :  { %vm288_vm3 = vcmp.gt.f32.partialorder %v2132_v40, 1.0  ;;  %v405_v47 = vmul.f32 %v2119_v22, %v2132_v40 }
  0xfe   :  { %v2136_v42 = vsel %vm285_vm2, 0.0, %v283_v41  ;;  %v1236_v43 = vsel %vm288_vm3, 1.0, %v1875_v0  ;;  %v294_v60 = vsel %vm288_vm3, 5.0, %v1875_v0 }
  0xff   :  { %vm289_vm4 = vcmp.gt.f32.partialorder %v2136_v42, 1.0  ;;  %v406_v51 = vmul.f32 %v2119_v22, %v2136_v42  ;;  %v2202_v62 = vadd.f32 -1.0, %v294_v60 }
 0x100   :  { %v1237_v44 = vsel %vm289_vm4, 1.0, %v1875_v0  ;;  %vm1245_vm5 = vmpackc.low %vm289_vm4, %vm288_vm3  ;;  %v295_v61 = vsel %vm289_vm4, 5.0, %v1875_v0 }
 0x101   :  { %v1348_v45 = vpack.c.bf16 %v1237_v44, %v1236_v43  ;;  %1599 = vmatmul.mubr.msk.bf16.vlgmr.msra.gmra.mrb[4].mxu1 %vm1245_vm5, %v1878_v46  ;;  %v2204_v17 = vadd.f32 -1.0, %v295_v61  ;;  %v362_v21 = vmax.f32 %v2202_v62, 0.0  ;;  %v1866_v44 = vld [vmem:[%s2629_s0 + $0x20] sm:$0xff]  }
 0x102   :  { %1623 = vmatpush3.bf16.msra.mxu1 %v1924_v2  ;;  %1638 = vmatprep.mubr.msk.bf16.mxu1 %vm1876_vm0, %v1875_v0 }
 0x103   :  { %1349 = vst [vmem:[%s2633_s6] sm:$0xff] %v1348_v45   ;;  %1624 = vmatprep.subr.bf16.mxu1 %v1875_v0  ;;  %v363_v26 = vmax.f32 %v2204_v17, 0.0  ;;  %vm417_vm7 = vcmp.le.f32.partialorder %v362_v21, 0.0  ;;  %1699 = vmatmul.mubr.bf16.vlgmr.msra.gmra.mrb[16].mxu0 %v1866_v44 }
 0x104   :  { %1723 = vmatpush3.bf16.msra.mxu0 %v1919_v1  ;;  %1738 = vmatprep.mubr.msk.bf16.mxu0 %vm1876_vm0, %v1875_v0 }
 0x105   :  { %vm418_vm10 = vcmp.le.f32.partialorder %v363_v26, 0.0  ;;  %1724 = vmatprep.subr.bf16.mxu0 %v1875_v0 }
 0x106   :  { %1625 = vmatpush3.bf16.msra.mxu1 %v1941_v4 }
 0x107   :  { %1626 = vmatprep.subr.bf16.mxu1 %v1875_v0 }
 0x108   :  { %1725 = vmatpush3.bf16.msra.mxu0 %v1934_v3 }
 0x109   :  { %1726 = vmatprep.subr.bf16.mxu0 %v1875_v0 }
 0x10a   :  { %1627 = vmatpush3.bf16.msra.mxu1 %v1955_v6 }
 0x10b   :  { %1628 = vmatprep.subr.bf16.mxu1 %v1875_v0 }
 0x10c   :  { %1727 = vmatpush3.bf16.msra.mxu0 %v1948_v5 }
 0x10d   :  { %1728 = vmatprep.subr.bf16.mxu0 %v1875_v0 }
 0x10e   :  { %1629 = vmatpush3.bf16.msra.mxu1 %v1969_v8 }
 0x10f   :  { %1630 = vmatprep.subr.bf16.mxu1 %v1875_v0 }
 0x110   :  { %1729 = vmatpush3.bf16.msra.mxu0 %v1962_v7 }
 0x111   :  { %1730 = vmatprep.subr.bf16.mxu0 %v1875_v0 }
 0x112   :  { %1631 = vmatpush3.bf16.msra.mxu1 %v1983_v10 }
 0x113   :  { %1632 = vmatprep.subr.bf16.mxu1 %v1875_v0 }
 0x114   :  { %1731 = vmatpush3.bf16.msra.mxu0 %v1976_v9 }
 0x115   :  { %v353_v48 = vpop.f32.mrb[4].mxu0  ;;  %1732 = vmatprep.subr.bf16.mxu0 %v1875_v0 }
 0x116   :  { %v407_v49 = vadd.f32 %v405_v47, %v353_v48  ;;  %v1580_v50 = vpop.f32.mrb[5].mxu0  ;;  %1633 = vmatpush3.bf16.msra.mxu1 %v1995_v12 }
 0x117   :  { %v356_v52 = vpop.f32.mrb[6].mxu0  ;;  %1634 = vmatprep.subr.bf16.mxu1 %v1875_v0 }
 0x118   :  { %v408_v53 = vadd.f32 %v406_v51, %v356_v52  ;;  %v1581_v54 = vpop.f32.mrb[7].mxu0  ;;  %1733 = vmatpush3.bf16.msra.mxu0 %v1990_v11 }
 0x119   :  { %1734 = vmatprep.subr.bf16.mxu0 %v1875_v0 }
 0x11a   :  { %1635 = vmatpush3.bf16.msra.mxu1 %v2011_v14 }
 0x11b   :  { %1636 = vmatprep.subr.bf16.mxu1 %v1875_v0 }
 0x11c   :  { %1735 = vmatpush3.bf16.msra.mxu0 %v2004_v13 }
 0x11d   :  { %1736 = vmatprep.subr.bf16.mxu0 %v1875_v0 }
 0x11e   :  { %1637 = vmatpush3.bf16.msra.mxu1 %v2025_v16 }
 0x11f   :  { %1662 = vmatprep.subr.bf16.mxu1 %v1875_v0 }
 0x120   :  { %1737 = vmatpush3.bf16.msra.mxu0 %v2018_v15 }
 0x121   :  { %1762 = vmatprep.subr.bf16.mxu0 %v1875_v0 }
 0x135   :  { %v481_v55 = vpop.f32.mrb[8].mxu0 }
 0x136   :  { %v1620_v56 = vpop.f32.mrb[9].mxu0 }
 0x137   :  { %v484_v57 = vpop.f32.mrb[10].mxu0 }
 0x138   :  { %v1621_v58 = vpop.f32.mrb[11].mxu0 }
 0x155   :  { %v609_v40 = vpop.f32.mrb[12].mxu0 }
 0x156   :  { %v1660_v41 = vpop.f32.mrb[13].mxu0 }
 0x157   :  { %v612_v42 = vpop.f32.mrb[14].mxu0 }
 0x158   :  { %v1661_v43 = vpop.f32.mrb[15].mxu0 }
 0x1d4   :  { %v398_v63 = vpop.f32.mrb[4].mxu1 }
 0x1d5   :  { %v409_v18 = vadd.f32 %v407_v49, %v398_v63  ;;  %v1600_v19 = vpop.f32.mrb[5].mxu1 }
 0x1d6   :  { %v401_v20 = vpop.f32.mrb[6].mxu1 }
 0x1d7   :  { %v411_v23 = vadd.f32 %v2129_v30, %v409_v18  ;;  %v410_v24 = vadd.f32 %v408_v53, %v401_v20  ;;  %v1601_v25 = vpop.f32.mrb[7].mxu1 }
 0x1d8   :  { %v737_v25 = vpop.f32.mrb[16].mxu0 }
 0x1d9   :  { %v412_v27 = vadd.f32 %v2129_v30, %v410_v24  ;;  %v2212_v28 = vsel %vm288_vm3, 0.0, %v411_v23 }
 0x1da   :  { %vm415_vm6 = vcmp.gt.f32.partialorder %v2212_v28, 1.0  ;;  %v533_v29 = vmul.f32 %v2119_v22, %v2212_v28 }
 0x1db   :  { %vm2221_vm8 = vmand %vm415_vm6, %vm417_vm7  ;;  %v2227_v32 = vsel %vm289_vm4, 0.0, %v412_v27 }
 0x1dc   :  { %v535_v33 = vadd.f32 %v533_v29, %v481_v55  ;;  %vm416_vm9 = vcmp.gt.f32.partialorder %v2227_v32, 1.0  ;;  %v534_v35 = vmul.f32 %v2119_v22, %v2227_v32  ;;  %v1247_v36 = vsel %vm2221_vm8, 1.0, %v1875_v0  ;;  %v1867_v29 = vld [vmem:[%s2629_s0 + $0x28] sm:$0xff]  }
 0x1dd   :  { %vm2232_vm11 = vmand %vm416_vm9, %vm418_vm10  ;;  %v421_v45 = vsel %vm2221_vm8, 5.0, %v362_v21  ;;  %1739 = vmatmul.mubr.bf16.vlgmr.msra.gmra.mrb[20].mxu0 %v1867_v29 }
 0x1de   :  { %v1248_v37 = vsel %vm2232_vm11, 1.0, %v1875_v0  ;;  %vm1258_vm12 = vmpackc.low %vm2232_vm11, %vm2221_vm8  ;;  %v536_v39 = vadd.f32 %v534_v35, %v484_v57  ;;  %v422_v47 = vsel %vm2232_vm11, 5.0, %v363_v26  ;;  %v2297_v48 = vadd.f32 -1.0, %v421_v45  ;;  %v1700_v26 = vpop.f32.mrb[17].mxu0  ;;  %1763 = vmatpush3.bf16.msra.mxu0 %v1919_v1  ;;  %1778 = vmatprep.mubr.msk.bf16.mxu0 %vm1876_vm0, %v1875_v0 }
 0x1df   :  { %v1351_v38 = vpack.c.bf16 %v1248_v37, %v1247_v36  ;;  %1639 = vmatmul.mubr.msk.bf16.vlgmr.msra.gmra.mrb[8].mxu1 %vm1258_vm12, %v1878_v46  ;;  %v2299_v49 = vadd.f32 -1.0, %v422_v47  ;;  %v740_v27 = vpop.f32.mrb[18].mxu0  ;;  %1764 = vmatprep.subr.bf16.mxu0 %v1875_v0 }
 0x1e0   :  { %1663 = vmatpush3.bf16.msra.mxu1 %v1924_v2  ;;  %1678 = vmatprep.mubr.msk.bf16.mxu1 %vm1876_vm0, %v1875_v0  ;;  %v490_v54 = vmax.f32 %v2297_v48, 0.0  ;;  %v1701_v28 = vpop.f32.mrb[19].mxu0 }
 0x1e1   :  { %1371 = vst [vmem:[%s2633_s6 + $0x8] sm:$0xff] %v1351_v38   ;;  %1664 = vmatprep.subr.bf16.mxu1 %v1875_v0  ;;  %v491_v58 = vmax.f32 %v2299_v49, 0.0 }
 0x1e2   :  { %vm545_vm14 = vcmp.le.f32.partialorder %v490_v54, 0.0  ;;  %1765 = vmatpush3.bf16.msra.mxu0 %v1934_v3 }
 0x1e3   :  { %vm546_vm2 = vcmp.le.f32.partialorder %v491_v58, 0.0  ;;  %1766 = vmatprep.subr.bf16.mxu0 %v1875_v0 }
 0x1e4   :  { %1665 = vmatpush3.bf16.msra.mxu1 %v1941_v4 }
 0x1e5   :  { %1666 = vmatprep.subr.bf16.mxu1 %v1875_v0 }
 0x1e6   :  { %1767 = vmatpush3.bf16.msra.mxu0 %v1948_v5 }
 0x1e7   :  { %1768 = vmatprep.subr.bf16.mxu0 %v1875_v0 }
 0x1e8   :  { %1667 = vmatpush3.bf16.msra.mxu1 %v1955_v6 }
 0x1e9   :  { %1668 = vmatprep.subr.bf16.mxu1 %v1875_v0 }
 0x1ea   :  { %1769 = vmatpush3.bf16.msra.mxu0 %v1962_v7 }
 0x1eb   :  { %1770 = vmatprep.subr.bf16.mxu0 %v1875_v0 }
 0x1ec   :  { %1669 = vmatpush3.bf16.msra.mxu1 %v1969_v8 }
 0x1ed   :  { %1670 = vmatprep.subr.bf16.mxu1 %v1875_v0 }
 0x1ee   :  { %1771 = vmatpush3.bf16.msra.mxu0 %v1976_v9 }
 0x1ef   :  { %1772 = vmatprep.subr.bf16.mxu0 %v1875_v0 }
 0x1f0   :  { %1671 = vmatpush3.bf16.msra.mxu1 %v1983_v10 }
 0x1f1   :  { %1672 = vmatprep.subr.bf16.mxu1 %v1875_v0 }
 0x1f2   :  { %1773 = vmatpush3.bf16.msra.mxu0 %v1990_v11 }
 0x1f3   :  { %1774 = vmatprep.subr.bf16.mxu0 %v1875_v0 }
 0x1f4   :  { %1673 = vmatpush3.bf16.msra.mxu1 %v1995_v12 }
 0x1f5   :  { %1674 = vmatprep.subr.bf16.mxu1 %v1875_v0 }
 0x1f6   :  { %1775 = vmatpush3.bf16.msra.mxu0 %v2004_v13 }
 0x1f7   :  { %1776 = vmatprep.subr.bf16.mxu0 %v1875_v0 }
 0x1f8   :  { %1675 = vmatpush3.bf16.msra.mxu1 %v2011_v14 }
 0x1f9   :  { %1676 = vmatprep.subr.bf16.mxu1 %v1875_v0 }
 0x1fa   :  { %1777 = vmatpush3.bf16.msra.mxu0 %v2018_v15 }
 0x1fb   :  { %1802 = vmatprep.subr.bf16.mxu0 %v1875_v0 }
 0x1fc   :  { %1677 = vmatpush3.bf16.msra.mxu1 %v2025_v16 }
 0x1fd   :  { %1702 = vmatprep.subr.bf16.mxu1 %v1875_v0 }
 0x2b2   :  { %v526_v50 = vpop.f32.mrb[8].mxu1 }
 0x2b3   :  { %v537_v51 = vadd.f32 %v535_v33, %v526_v50  ;;  %v1640_v52 = vpop.f32.mrb[9].mxu1 }
 0x2b4   :  { %v529_v53 = vpop.f32.mrb[10].mxu1 }
 0x2b5   :  { %v539_v55 = vadd.f32 %v2129_v30, %v537_v51  ;;  %v538_v56 = vadd.f32 %v536_v39, %v529_v53  ;;  %v1641_v57 = vpop.f32.mrb[11].mxu1 }
 0x2b6   :  { %v865_v57 = vpop.f32.mrb[20].mxu0 }
 0x2b7   :  { %v540_v59 = vadd.f32 %v2129_v30, %v538_v56  ;;  %v2307_v60 = vsel %vm415_vm6, 0.0, %v539_v55 }
 0x2b8   :  { %vm543_vm13 = vcmp.gt.f32.partialorder %v2307_v60, 1.0  ;;  %v661_v61 = vmul.f32 %v2119_v22, %v2307_v60 }
 0x2b9   :  { %vm2316_vm15 = vmand %vm543_vm13, %vm545_vm14  ;;  %v2322_v63 = vsel %vm416_vm9, 0.0, %v540_v59 }
 0x2ba   :  { %v663_v17 = vadd.f32 %v661_v61, %v609_v40  ;;  %vm544_vm1 = vcmp.gt.f32.partialorder %v2322_v63, 1.0  ;;  %v662_v19 = vmul.f32 %v2119_v22, %v2322_v63  ;;  %v1260_v20 = vsel %vm2316_vm15, 1.0, %v1875_v0  ;;  %v1868_v61 = vld [vmem:[%s2629_s0 + $0x30] sm:$0xff]  }
 0x2bb   :  { %vm2327_vm3 = vmand %vm544_vm1, %vm546_vm2  ;;  %v549_v31 = vsel %vm2316_vm15, 5.0, %v490_v54  ;;  %1779 = vmatmul.mubr.bf16.vlgmr.msra.gmra.mrb[24].mxu0 %v1868_v61  ;;  %v1871_v61 = vld [vmem:[%s2628_s2 + $0x8] sm:$0xff]  }
 0x2bc   :  { %v1261_v21 = vsel %vm2327_vm3, 1.0, %v1875_v0  ;;  %vm1271_vm4 = vmpackc.low %vm2327_vm3, %vm2316_vm15  ;;  %v664_v24 = vadd.f32 %v662_v19, %v612_v42  ;;  %v550_v32 = vsel %vm2327_vm3, 5.0, %v491_v58  ;;  %v2392_v33 = vadd.f32 -1.0, %v549_v31  ;;  %v1740_v58 = vpop.f32.mrb[21].mxu0  ;;  %1803 = vmatpush3.bf16.msra.mxu0 %v1919_v1  ;;  %1818 = vmatprep.mubr.msk.bf16.mxu0 %vm1876_vm0, %v1875_v0 }
 0x2bd   :  { %v1354_v23 = vpack.c.bf16 %v1261_v21, %v1260_v20  ;;  %1679 = vmatmul.mubr.msk.bf16.vlgmr.msra.gmra.mrb[12].mxu1 %vm1271_vm4, %v1878_v46  ;;  %v2394_v34 = vadd.f32 -1.0, %v550_v32  ;;  %v868_v59 = vpop.f32.mrb[22].mxu0  ;;  %1804 = vmatprep.subr.bf16.mxu0 %v1875_v0 }
 0x2be   :  { %1703 = vmatpush3.bf16.msra.mxu1 %v1924_v2  ;;  %1718 = vmatprep.mubr.msk.bf16.mxu1 %vm1876_vm0, %v1875_v0  ;;  %v618_v39 = vmax.f32 %v2392_v33, 0.0  ;;  %v1741_v60 = vpop.f32.mrb[23].mxu0 }
 0x2bf   :  { %1372 = vst [vmem:[%s2633_s6 + $0x10] sm:$0xff] %v1354_v23   ;;  %1704 = vmatprep.subr.bf16.mxu1 %v1875_v0  ;;  %v619_v43 = vmax.f32 %v2394_v34, 0.0  ;;  %v1870_v60 = vld [vmem:[%s2628_s2] sm:$0xff]  }
 0x2c0   :  { %vm673_vm6 = vcmp.le.f32.partialorder %v618_v39, 0.0  ;;  %1805 = vmatpush3.bf16.msra.mxu0 %v1934_v3 }
 0x2c1   :  { %vm674_vm9 = vcmp.le.f32.partialorder %v619_v43, 0.0  ;;  %1806 = vmatprep.subr.bf16.mxu0 %v1875_v0 }
 0x2c2   :  { %1705 = vmatpush3.bf16.msra.mxu1 %v1941_v4 }
 0x2c3   :  { %1706 = vmatprep.subr.bf16.mxu1 %v1875_v0 }
 0x2c4   :  { %1807 = vmatpush3.bf16.msra.mxu0 %v1948_v5 }
 0x2c5   :  { %1808 = vmatprep.subr.bf16.mxu0 %v1875_v0 }
 0x2c6   :  { %1707 = vmatpush3.bf16.msra.mxu1 %v1955_v6 }
 0x2c7   :  { %1708 = vmatprep.subr.bf16.mxu1 %v1875_v0 }
 0x2c8   :  { %1809 = vmatpush3.bf16.msra.mxu0 %v1962_v7 }
 0x2c9   :  { %1810 = vmatprep.subr.bf16.mxu0 %v1875_v0 }
 0x2ca   :  { %1709 = vmatpush3.bf16.msra.mxu1 %v1969_v8 }
 0x2cb   :  { %1710 = vmatprep.subr.bf16.mxu1 %v1875_v0 }
 0x2cc   :  { %1811 = vmatpush3.bf16.msra.mxu0 %v1976_v9 }
 0x2cd   :  { %1812 = vmatprep.subr.bf16.mxu0 %v1875_v0 }
 0x2ce   :  { %1711 = vmatpush3.bf16.msra.mxu1 %v1983_v10 }
 0x2cf   :  { %1712 = vmatprep.subr.bf16.mxu1 %v1875_v0 }
 0x2d0   :  { %1813 = vmatpush3.bf16.msra.mxu0 %v1990_v11 }
 0x2d1   :  { %1814 = vmatprep.subr.bf16.mxu0 %v1875_v0 }
 0x2d2   :  { %1713 = vmatpush3.bf16.msra.mxu1 %v1995_v12 }
 0x2d3   :  { %1714 = vmatprep.subr.bf16.mxu1 %v1875_v0 }
 0x2d4   :  { %1815 = vmatpush3.bf16.msra.mxu0 %v2004_v13 }
 0x2d5   :  { %1816 = vmatprep.subr.bf16.mxu0 %v1875_v0 }
 0x2d6   :  { %1715 = vmatpush3.bf16.msra.mxu1 %v2011_v14 }
 0x2d7   :  { %1716 = vmatprep.subr.bf16.mxu1 %v1875_v0 }
 0x2d8   :  { %1817 = vmatpush3.bf16.msra.mxu0 %v2018_v15 }
 0x2da   :  { %1717 = vmatpush3.bf16.msra.mxu1 %v2025_v16 }
 0x2db   :  { %1742 = vmatprep.subr.bf16.mxu1 %v1875_v0 }
 0x390   :  { %v654_v35 = vpop.f32.mrb[12].mxu1 }
 0x391   :  { %v665_v36 = vadd.f32 %v663_v17, %v654_v35  ;;  %v1680_v37 = vpop.f32.mrb[13].mxu1 }
 0x392   :  { %v657_v38 = vpop.f32.mrb[14].mxu1 }
 0x393   :  { %v667_v40 = vadd.f32 %v2129_v30, %v665_v36  ;;  %v666_v41 = vadd.f32 %v664_v24, %v657_v38  ;;  %v1681_v42 = vpop.f32.mrb[15].mxu1 }
 0x395   :  { %v668_v44 = vadd.f32 %v2129_v30, %v666_v41  ;;  %v2402_v45 = vsel %vm543_vm13, 0.0, %v667_v40 }
 0x396   :  { %vm671_vm5 = vcmp.gt.f32.partialorder %v2402_v45, 1.0  ;;  %v789_v47 = vmul.f32 %v2119_v22, %v2402_v45 }
 0x397   :  { %vm2411_vm7 = vmand %vm671_vm5, %vm673_vm6  ;;  %v2417_v49 = vsel %vm544_vm1, 0.0, %v668_v44 }
 0x398   :  { %v791_v50 = vadd.f32 %v789_v47, %v737_v25  ;;  %vm672_vm8 = vcmp.gt.f32.partialorder %v2417_v49, 1.0  ;;  %v790_v52 = vmul.f32 %v2119_v22, %v2417_v49  ;;  %v1273_v53 = vsel %vm2411_vm7, 1.0, %v1875_v0 }
 0x399   :  { %vm2422_vm10 = vmand %vm672_vm8, %vm674_vm9  ;;  %v677_v1 = vsel %vm2411_vm7, 5.0, %v618_v39 }
 0x39a   :  { %v1274_v54 = vsel %vm2422_vm10, 1.0, %v1875_v0  ;;  %vm1284_vm11 = vmpackc.low %vm2422_vm10, %vm2411_vm7  ;;  %v792_v56 = vadd.f32 %v790_v52, %v740_v27  ;;  %v678_v3 = vsel %vm2422_vm10, 5.0, %v619_v43  ;;  %v1282_v5 = vadd.f32 -1.0, %v677_v1  ;;  %v1872_v1 = vld [vmem:[%s2628_s2 + $0x10] sm:$0xff]  }
 0x39b   :  { %v1357_v55 = vpack.c.bf16 %v1274_v54, %v1273_v53  ;;  %1719 = vmatmul.mubr.msk.bf16.vlgmr.msra.gmra.mrb[16].mxu1 %vm1284_vm11, %v1878_v46  ;;  %v1283_v7 = vadd.f32 -1.0, %v678_v3  ;;  %v1873_v3 = vld [vmem:[%s2628_s2 + $0x18] sm:$0xff]  }
 0x39c   :  { %1743 = vmatpush3.bf16.msra.mxu1 %v1924_v2  ;;  %1758 = vmatprep.mubr.msk.bf16.mxu1 %vm1876_vm0, %v1875_v0  ;;  %v746_v17 = vmax.f32 %v1282_v5, 0.0  ;;  %v1874_v5 = vld [vmem:[%s2628_s2 + $0x20] sm:$0xff]  }
 0x39d   :  { %1373 = vst [vmem:[%s2633_s6 + $0x18] sm:$0xff] %v1357_v55   ;;  %1744 = vmatprep.subr.bf16.mxu1 %v1875_v0  ;;  %v747_v15 = vmax.f32 %v1283_v7, 0.0 }
 0x39e   :  { %vm801_vm13 = vcmp.le.f32.partialorder %v746_v17, 0.0 }
 0x39f   :  { %vm802_vm1 = vcmp.le.f32.partialorder %v747_v15, 0.0 }
 0x3a0   :  { %1745 = vmatpush3.bf16.msra.mxu1 %v1941_v4 }
 0x3a1   :  { %1746 = vmatprep.subr.bf16.mxu1 %v1875_v0 }
 0x3a4   :  { %1747 = vmatpush3.bf16.msra.mxu1 %v1955_v6 }
 0x3a5   :  { %1748 = vmatprep.subr.bf16.mxu1 %v1875_v0 }
 0x3a8   :  { %1749 = vmatpush3.bf16.msra.mxu1 %v1969_v8 }
 0x3a9   :  { %1750 = vmatprep.subr.bf16.mxu1 %v1875_v0 }
 0x3ac   :  { %1751 = vmatpush3.bf16.msra.mxu1 %v1983_v10 }
 0x3ad   :  { %1752 = vmatprep.subr.bf16.mxu1 %v1875_v0 }
 0x3b0   :  { %1753 = vmatpush3.bf16.msra.mxu1 %v1995_v12 }
 0x3b1   :  { %1754 = vmatprep.subr.bf16.mxu1 %v1875_v0 }
 0x3b4   :  { %1755 = vmatpush3.bf16.msra.mxu1 %v2011_v14 }
 0x3b5   :  { %1756 = vmatprep.subr.bf16.mxu1 %v1875_v0 }
 0x3b8   :  { %1757 = vmatpush3.bf16.msra.mxu1 %v2025_v16 }
 0x3b9   :  { %1782 = vmatprep.subr.bf16.mxu1 %v1875_v0 }
 0x46e   :  { %v782_v9 = vpop.f32.mrb[16].mxu1 }
 0x46f   :  { %v793_v11 = vadd.f32 %v791_v50, %v782_v9  ;;  %v1720_v62 = vpop.f32.mrb[17].mxu1 }
 0x470   :  { %v785_v63 = vpop.f32.mrb[18].mxu1 }
 0x471   :  { %v795_v13 = vadd.f32 %v2129_v30, %v793_v11  ;;  %v794_v18 = vadd.f32 %v792_v56, %v785_v63  ;;  %v1721_v19 = vpop.f32.mrb[19].mxu1 }
 0x473   :  { %v796_v20 = vadd.f32 %v2129_v30, %v794_v18  ;;  %v797_v21 = vsel %vm671_vm5, 0.0, %v795_v13 }
 0x474   :  { %vm799_vm12 = vcmp.gt.f32.partialorder %v797_v21, 1.0  ;;  %v917_v23 = vmul.f32 %v2119_v22, %v797_v21 }
 0x475   :  { %vm2492_vm14 = vmand %vm799_vm12, %vm801_vm13  ;;  %v798_v25 = vsel %vm672_vm8, 0.0, %v796_v20 }
 0x476   :  { %v919_v26 = vadd.f32 %v917_v23, %v865_v57  ;;  %vm800_vm15 = vcmp.gt.f32.partialorder %v798_v25, 1.0  ;;  %v918_v28 = vmul.f32 %v2119_v22, %v798_v25  ;;  %v1286_v29 = vsel %vm2492_vm14, 1.0, %v1875_v0 }
 0x477   :  { %vm2499_vm2 = vmand %vm800_vm15, %vm802_vm1  ;;  %v805_v34 = vsel %vm2492_vm14, 5.0, %v746_v17 }
 0x478   :  { %v1287_v31 = vsel %vm2499_vm2, 1.0, %v1875_v0  ;;  %vm1297_vm3 = vmpackc.low %vm2499_vm2, %vm2492_vm14  ;;  %v920_v33 = vadd.f32 %v918_v28, %v868_v59  ;;  %v806_v35 = vsel %vm2499_vm2, 5.0, %v747_v15  ;;  %v1295_v36 = vadd.f32 -1.0, %v805_v34 }
 0x479   :  { %v1360_v32 = vpack.c.bf16 %v1287_v31, %v1286_v29  ;;  %1759 = vmatmul.mubr.msk.bf16.vlgmr.msra.gmra.mrb[20].mxu1 %vm1297_vm3, %v1878_v46  ;;  %v1296_v37 = vadd.f32 -1.0, %v806_v35 }
 0x47a   :  { %1783 = vmatpush3.bf16.msra.mxu1 %v1924_v2  ;;  %1798 = vmatprep.mubr.msk.bf16.mxu1 %vm1876_vm0, %v1875_v0  ;;  %v993_v2 = vpop.f32.mrb[24].mxu0  ;;  %v874_v42 = vmax.f32 %v1295_v36, 0.0 }
 0x47b   :  { %1374 = vst [vmem:[%s2633_s6 + $0x20] sm:$0xff] %v1360_v32   ;;  %1784 = vmatprep.subr.bf16.mxu1 %v1875_v0  ;;  %v875_v47 = vmax.f32 %v1296_v37, 0.0 }
 0x47c   :  { %vm929_vm5 = vcmp.le.f32.partialorder %v874_v42, 0.0 }
 0x47d   :  { %vm930_vm8 = vcmp.le.f32.partialorder %v875_v47, 0.0 }
 0x47e   :  { %1785 = vmatpush3.bf16.msra.mxu1 %v1941_v4  ;;  %v1780_v4 = vpop.f32.mrb[25].mxu0 }
 0x47f   :  { %1786 = vmatprep.subr.bf16.mxu1 %v1875_v0 }
 0x482   :  { %1787 = vmatpush3.bf16.msra.mxu1 %v1955_v6  ;;  %v996_v6 = vpop.f32.mrb[26].mxu0 }
 0x483   :  { %1788 = vmatprep.subr.bf16.mxu1 %v1875_v0 }
 0x486   :  { %1789 = vmatpush3.bf16.msra.mxu1 %v1969_v8  ;;  %v1781_v8 = vpop.f32.mrb[27].mxu0 }
 0x487   :  { %1790 = vmatprep.subr.bf16.mxu1 %v1875_v0 }
 0x48a   :  { %1791 = vmatpush3.bf16.msra.mxu1 %v1983_v10  ;;  %v1869_v10 = vld [vmem:[%s2629_s0 + $0x38] sm:$0xff]  }
 0x48b   :  { %1792 = vmatprep.subr.bf16.mxu1 %v1875_v0  ;;  %1819 = vmatmul.mubr.bf16.vlgmr.msra.gmra.mrb[28].mxu0 %v1869_v10 }
 0x48e   :  { %1793 = vmatpush3.bf16.msra.mxu1 %v1995_v12 }
 0x48f   :  { %1794 = vmatprep.subr.bf16.mxu1 %v1875_v0 }
 0x492   :  { %1795 = vmatpush3.bf16.msra.mxu1 %v2011_v14 }
 0x493   :  { %1796 = vmatprep.subr.bf16.mxu1 %v1875_v0 }
 0x496   :  { %1797 = vmatpush3.bf16.msra.mxu1 %v2025_v16 }
 0x497   :  { %1822 = vmatprep.subr.bf16.mxu1 %v1875_v0 }
 0x54c   :  { %v910_v38 = vpop.f32.mrb[20].mxu1 }
 0x54d   :  { %v921_v39 = vadd.f32 %v919_v26, %v910_v38  ;;  %v1760_v40 = vpop.f32.mrb[21].mxu1 }
 0x54e   :  { %v913_v41 = vpop.f32.mrb[22].mxu1 }
 0x54f   :  { %v923_v43 = vadd.f32 %v2129_v30, %v921_v39  ;;  %v922_v44 = vadd.f32 %v920_v33, %v913_v41  ;;  %v1761_v45 = vpop.f32.mrb[23].mxu1 }
 0x551   :  { %v924_v48 = vadd.f32 %v2129_v30, %v922_v44  ;;  %v925_v49 = vsel %vm799_vm12, 0.0, %v923_v43 }
 0x552   :  { %vm927_vm4 = vcmp.gt.f32.partialorder %v925_v49, 1.0  ;;  %v1045_v50 = vmul.f32 %v2119_v22, %v925_v49 }
 0x553   :  { %vm2548_vm6 = vmand %vm927_vm4, %vm929_vm5  ;;  %v926_v52 = vsel %vm800_vm15, 0.0, %v924_v48 }
 0x554   :  { %v1047_v53 = vadd.f32 %v1045_v50, %v993_v2  ;;  %vm928_vm7 = vcmp.gt.f32.partialorder %v926_v52, 1.0  ;;  %v1046_v55 = vmul.f32 %v2119_v22, %v926_v52  ;;  %v1299_v56 = vsel %vm2548_vm6, 1.0, %v1875_v0 }
 0x555   :  { %vm2554_vm9 = vmand %vm928_vm7, %vm930_vm8  ;;  %v933_v63 = vsel %vm2548_vm6, 5.0, %v874_v42 }
 0x556   :  { %v1300_v57 = vsel %vm2554_vm9, 1.0, %v1875_v0  ;;  %vm1310_vm10 = vmpackc.low %vm2554_vm9, %vm2548_vm6  ;;  %v1048_v59 = vadd.f32 %v1046_v55, %v996_v6  ;;  %v934_v17 = vsel %vm2554_vm9, 5.0, %v875_v47  ;;  %v1308_v13 = vadd.f32 -1.0, %v933_v63 }
 0x557   :  { %v1363_v58 = vpack.c.bf16 %v1300_v57, %v1299_v56  ;;  %1799 = vmatmul.mubr.msk.bf16.vlgmr.msra.gmra.mrb[24].mxu1 %vm1310_vm10, %v1878_v46 }
 0x558   :  { %1823 = vmatpush3.bf16.msra.mxu1 %v1870_v60  ;;  %1838 = vmatprep.mubr.msk.bf16.mxu1 %vm1876_vm0, %v1875_v0  ;;  %v1002_v20 = vmax.f32 %v1308_v13, 0.0 }
 0x559   :  { %1375 = vst [vmem:[%s2633_s6 + $0x28] sm:$0xff] %v1363_v58   ;;  %1824 = vmatprep.subr.bf16.mxu1 %v1875_v0 }
 0x55a   :  { %vm1057_vm11 = vcmp.le.f32.partialorder %v1002_v20, 0.0 }
 0x55c   :  { %1825 = vmatpush3.bf16.msra.mxu1 %v1871_v61 }
 0x55d   :  { %1826 = vmatprep.subr.bf16.mxu1 %v1875_v0 }
 0x55e   :  { %v1121_v7 = vpop.f32.mrb[28].mxu0 }
 0x55f   :  { %v1820_v9 = vpop.f32.mrb[29].mxu0 }
 0x560   :  { %1827 = vmatpush3.bf16.msra.mxu1 %v1872_v1  ;;  %v1124_v11 = vpop.f32.mrb[30].mxu0 }
 0x561   :  { %1828 = vmatprep.subr.bf16.mxu1 %v1875_v0  ;;  %v1821_v62 = vpop.f32.mrb[31].mxu0 }
 0x564   :  { %1829 = vmatpush3.bf16.msra.mxu1 %v1873_v3 }
 0x565   :  { %1830 = vmatprep.subr.bf16.mxu1 %v1875_v0 }
 0x568   :  { %1831 = vmatpush3.bf16.msra.mxu1 %v1874_v5 }
 0x569   :  { %1832 = vmatprep.subr.bf16.mxu1 %v1875_v0 }
 0x56c   :  { %1833 = vmatpush3.bf16.msra.mxu1 %v1995_v12  ;;  %v1309_v12 = vadd.f32 -1.0, %v934_v17 }
 0x56d   :  { %1834 = vmatprep.subr.bf16.mxu1 %v1875_v0 }
 0x56e   :  { %v1003_v24 = vmax.f32 %v1309_v12, 0.0 }
 0x570   :  { %1835 = vmatpush3.bf16.msra.mxu1 %v2011_v14  ;;  %vm1058_vm14 = vcmp.le.f32.partialorder %v1003_v24, 0.0 }
 0x571   :  { %1836 = vmatprep.subr.bf16.mxu1 %v1875_v0 }
 0x574   :  { %1837 = vmatpush3.bf16.msra.mxu1 %v2025_v16 }
 0x62a   :  { %v1038_v18 = vpop.f32.mrb[24].mxu1 }
 0x62b   :  { %v1049_v19 = vadd.f32 %v1047_v53, %v1038_v18  ;;  %v1800_v15 = vpop.f32.mrb[25].mxu1 }
 0x62c   :  { %v1041_v14 = vpop.f32.mrb[26].mxu1 }
 0x62d   :  { %v1051_v21 = vadd.f32 %v2129_v30, %v1049_v19  ;;  %v1050_v16 = vadd.f32 %v1048_v59, %v1041_v14  ;;  %v1801_v23 = vpop.f32.mrb[27].mxu1 }
 0x62f   :  { %v1052_v25 = vadd.f32 %v2129_v30, %v1050_v16  ;;  %v1053_v26 = vsel %vm927_vm4, 0.0, %v1051_v21 }
 0x630   :  { %vm1055_vm0 = vcmp.gt.f32.partialorder %v1053_v26, 1.0  ;;  %v1173_v27 = vmul.f32 %v2119_v22, %v1053_v26 }
 0x631   :  { %vm1059_vm12 = vmand %vm1055_vm0, %vm1057_vm11  ;;  %v1054_v28 = vsel %vm928_vm7, 0.0, %v1052_v25 }
 0x632   :  { %v1175_v29 = vadd.f32 %v1173_v27, %v1121_v7  ;;  %vm1056_vm13 = vcmp.gt.f32.partialorder %v1054_v28, 1.0  ;;  %v1174_v31 = vmul.f32 %v2119_v22, %v1054_v28  ;;  %v1312_v32 = vsel %vm1059_vm12, 1.0, %v1875_v0 }
 0x633   :  { %vm1060_vm15 = vmand %vm1056_vm13, %vm1058_vm14  ;;  %v1061_v6 = vsel %vm1059_vm12, 5.0, %v1002_v20 }
 0x634   :  { %v1313_v33 = vsel %vm1060_vm15, 1.0, %v1875_v0  ;;  %vm1323_vm1 = vmpackc.low %vm1060_vm15, %vm1059_vm12  ;;  %v1176_v4 = vadd.f32 %v1174_v31, %v1124_v11  ;;  %v1062_v8 = vsel %vm1060_vm15, 5.0, %v1003_v24  ;;  %v1321_v10 = vadd.f32 -1.0, %v1061_v6 }
 0x635   :  { %v1366_v2 = vpack.c.bf16 %v1313_v33, %v1312_v32  ;;  %1839 = vmatmul.mubr.msk.bf16.vlgmr.msra.gmra.mrb[28].mxu1 %vm1323_vm1, %v1878_v46  ;;  %v1322_v35 = vadd.f32 -1.0, %v1062_v8 }
 0x636   :  { %v1130_v37 = vmax.f32 %v1321_v10, 0.0 }
 0x637   :  { %1376 = vst [vmem:[%s2633_s6 + $0x30] sm:$0xff] %v1366_v2   ;;  %v1131_v42 = vmax.f32 %v1322_v35, 0.0 }
 0x638   :  { %vm1185_vm3 = vcmp.le.f32.partialorder %v1130_v37, 0.0 }
 0x639   :  { %vm1186_vm6 = vcmp.le.f32.partialorder %v1131_v42, 0.0 }
 0x708   :  { %v1166_v34 = vpop.f32.mrb[28].mxu1 }
 0x709   :  { %v1177_v36 = vadd.f32 %v1175_v29, %v1166_v34  ;;  %v1840_v22 = vpop.f32.mrb[29].mxu1 }
 0x70a   :  { %v1169_v38 = vpop.f32.mrb[30].mxu1 }
 0x70b   :  { %v1179_v39 = vadd.f32 %v2129_v30, %v1177_v36  ;;  %v1178_v40 = vadd.f32 %v1176_v4, %v1169_v38  ;;  %v1841_v41 = vpop.f32.mrb[31].mxu1 }
 0x70d   :  { %v1181_v46 = vsel %vm1055_vm0, 0.0, %v1179_v39  ;;  %v1180_v43 = vadd.f32 %v2129_v30, %v1178_v40 }
 0x70e   :  { %vm1183_vm2 = vcmp.gt.f32.partialorder %v1181_v46, 1.0 }
 0x70f   :  { %vm1187_vm4 = vmand %vm1183_vm2, %vm1185_vm3  ;;  %v1182_v44 = vsel %vm1056_vm13, 0.0, %v1180_v43 }
 0x710   :  { %vm1184_vm5 = vcmp.gt.f32.partialorder %v1182_v44, 1.0  ;;  %v1325_v45 = vsel %vm1187_vm4, 1.0, %v1875_v0 }
 0x711   :  { %vm1188_vm7 = vmand %vm1184_vm5, %vm1186_vm6 }
 0x712   :  { %v1326_v47 = vsel %vm1188_vm7, 1.0, %v1875_v0 }
 0x713   :  { %v1195_v48 = vpack.c.bf16 %v1326_v47, %v1325_v45 }
 0x715   :  { %1377 = vst [vmem:[%s2633_s6 + $0x38] sm:$0xff] %v1195_v48  }

</bundles_post_ra>
